<compile_context>
chip_gen: v7x
topology: tpu7x:2x2x1
jax: 0.10.0
libtpu: 0.0.40
codegen_flags: <defaults>
</compile_context>

<pallas_src>
import jax
import jax.numpy as jnp
from jax.experimental import pallas as pl
from jax.experimental.pallas import tpu as pltpu

LANE = 128                       # channel axis is padded to a multiple of this
_VMEM_LIMIT = 32 * 1024 * 1024   # explicit scoped-VMEM budget (safe on v5e/v6e/v7x)
_BN_EPS = 1e-5


def _round_up(x, m):
    return (x + m - 1) // m * m


def _compiler_params():
    return pltpu.CompilerParams(dimension_semantics=("parallel",),
                                vmem_limit_bytes=_VMEM_LIMIT)


# ----------------------------- Pallas kernels ------------------------------

def _make_conv3x3_kernel(h, w, cpad, apply_bn, add_res):
    """3x3 conv (padding=1) over a lane-padded (1, h, w, cpad) NHWC tile.

    The 9 taps are accumulated in-kernel from a zero-haloed VMEM scratch.
    Optionally fuses a preceding BatchNorm+ReLU (folded scale/shift) on the
    input tile and a residual add on the output tile (used to realise channel
    concatenation without a separate HBM pass).
    """

    def kernel(*refs):
        i = 0
        x_ref = refs[i]; i += 1
        if apply_bn:
            scale_ref, shift_ref = refs[i], refs[i + 1]; i += 2
        w_ref, b_ref = refs[i], refs[i + 1]; i += 2
        if add_res:
            res_ref = refs[i]; i += 1
        o_ref, xp_ref, acc_ref = refs[i], refs[i + 1], refs[i + 2]

        xt = x_ref[0]                                          # (h, w, cpad)
        if apply_bn:
            xt = jnp.maximum(xt * scale_ref[0] + shift_ref[0], 0.0)

        # zero-haloed copy of the (normalised) input tile
        xp_ref[...] = jnp.zeros_like(xp_ref)
        xp_ref[pl.ds(1, h), pl.ds(1, w), :] = xt

        acc_ref[...] = jnp.zeros_like(acc_ref)
        for t in range(9):                                     # 9 shifted MXU taps
            dy, dx = divmod(t, 3)
            tap = xp_ref[pl.ds(dy, h), pl.ds(dx, w), :].reshape(h * w, cpad)
            acc_ref[...] += jnp.dot(tap, w_ref[t],
                                    preferred_element_type=jnp.float32)

        out = (acc_ref[...] + b_ref[...]).reshape(h, w, cpad)
        if add_res:
            out = out + res_ref[0]
        o_ref[0] = out

    return kernel


def _bn_matmul_res_kernel(x_ref, scale_ref, shift_ref, w_ref, b_ref, res_ref, o_ref):
    """o = relu(x*scale + shift) @ w + b + res   (BN+ReLU -> 1x1 conv -> concat)."""
    xn = jnp.maximum(x_ref[...] * scale_ref[...] + shift_ref[...], 0.0)
    o_ref[...] = (jnp.dot(xn, w_ref[...], preferred_element_type=jnp.float32)
                  + b_ref[...] + res_ref[...])


def _make_fused_attention_kernel(h, w, cpad):
    """branch1 / branch2 / branch3 of FourBranchModule from ONE read of x."""

    def kernel(x_ref, ca_ref, w1_ref, b1_ref, w2_ref, b2_ref, wsp_ref, bsp_ref,
               o1_ref, o2_ref, o3_ref):
        x = x_ref[0].reshape(h * w, cpad)
        # branch1 -- pixel attention: x * sigmoid(conv1x1(conv1x1(x)))     (MXU)
        a = jnp.dot(x, w1_ref[...], preferred_element_type=jnp.float32) + b1_ref[...]
        t = jnp.dot(a, w2_ref[...], preferred_element_type=jnp.float32) + b2_ref[...]
        o1_ref[0] = (x * jax.nn.sigmoid(t)).reshape(h, w, cpad)
        # branch2 -- channel attention: x * sigmoid(conv1x1(avgpool(x)))
        #            (per-image attention vector precomputed in glue)
        o2_ref[0] = (x * ca_ref[0]).reshape(h, w, cpad)
        # branch3 -- spatial attention: x * sigmoid(<x, w_sp> + b_sp)
        #            (VPU lane-reduce instead of a lane-1 MXU matmul)
        s = jnp.sum(x * wsp_ref[...], axis=-1, keepdims=True) + bsp_ref[...]
        o3_ref[0] = (x * jax.nn.sigmoid(s)).reshape(h, w, cpad)

    return kernel


# ----------------------------- Pallas wrappers ------------------------------

def conv3x3_padded(x, w9, b, scale=None, shift=None, res=None):
    """3x3 conv on a lane-padded slab.  x:(N,H,W,CP)  w9:(9,CP,CP)  vectors:(CP,)."""
    # TODO(synk): for large H*W the conv should tile rows with an explicit halo
    # DMA; one image per grid step is VMEM-safe only at moderate spatial sizes.
    N, H, W, CP = x.shape
    apply_bn = scale is not None
    add_res = res is not None

    tile = pl.BlockSpec((1, H, W, CP), lambda n: (n, 0, 0, 0))
    vec = pl.BlockSpec((1, CP), lambda n: (0, 0))

    in_specs, args = [tile], [x]
    if apply_bn:
        in_specs += [vec, vec]
        args += [scale.reshape(1, CP), shift.reshape(1, CP)]
    in_specs += [pl.BlockSpec((9, CP, CP), lambda n: (0, 0, 0)), vec]
    args += [w9, b.reshape(1, CP)]
    if add_res:
        in_specs += [tile]
        args += [res]

    return pl.pallas_call(
        _make_conv3x3_kernel(H, W, CP, apply_bn, add_res),
        out_shape=jax.ShapeDtypeStruct((N, H, W, CP), jnp.float32),
        grid=(N,),
        in_specs=in_specs,
        out_specs=tile,
        scratch_shapes=[pltpu.VMEM((H + 2, W + 2, CP), jnp.float32),
                        pltpu.VMEM((H * W, CP), jnp.float32)],
        compiler_params=_compiler_params(),
    )(*args)


def _pick_row_tile(m):
    for t in (1024, 512, 256, 128):
        if m >= 2 * t:
            return t
    return m


def bn_conv1x1_res_padded(x, scale, shift, w, b, res):
    """relu(BN(x)) @ w + b + res, tiled over the flattened N*H*W row axis."""
    N, H, W, CP = x.shape
    M = N * H * W
    tm = _pick_row_tile(M)
    mp = _round_up(M, tm)
    x2 = x.reshape(M, CP)
    r2 = res.reshape(M, CP)
    if mp != M:          # pad rows instead of collapsing to one giant block
        x2 = jnp.pad(x2, ((0, mp - M), (0, 0)))
        r2 = jnp.pad(r2, ((0, mp - M), (0, 0)))

    row = pl.BlockSpec((tm, CP), lambda i: (i, 0))
    vec = pl.BlockSpec((1, CP), lambda i: (0, 0))
    y = pl.pallas_call(
        _bn_matmul_res_kernel,
        out_shape=jax.ShapeDtypeStruct((mp, CP), jnp.float32),
        grid=(mp // tm,),
        in_specs=[row, vec, vec, pl.BlockSpec((CP, CP), lambda i: (0, 0)), vec, row],
        out_specs=row,
        compiler_params=_compiler_params(),
    )(x2, scale.reshape(1, CP), shift.reshape(1, CP), w, b.reshape(1, CP), r2)
    return y[:M].reshape(N, H, W, CP)


def fused_attention_padded(x, ca, w1, b1, w2, b2, wsp, bsp):
    """All three attention branches from a single pass over x."""
    N, H, W, CP = x.shape
    tile = pl.BlockSpec((1, H, W, CP), lambda n: (n, 0, 0, 0))
    vec = pl.BlockSpec((1, CP), lambda n: (0, 0))
    mat = pl.BlockSpec((CP, CP), lambda n: (0, 0))
    return pl.pallas_call(
        _make_fused_attention_kernel(H, W, CP),
        out_shape=(jax.ShapeDtypeStruct((N, H, W, CP), jnp.float32),) * 3,
        grid=(N,),
        in_specs=[tile,
                  pl.BlockSpec((1, 1, CP), lambda n: (n, 0, 0)),   # per-image ch-attn vec
                  mat, vec, mat, vec,                              # pixel-attn 1x1 convs
                  vec,                                             # spatial-attn weight row
                  pl.BlockSpec((1, 1), lambda n: (0, 0))],         # spatial-attn bias
        out_specs=(tile,) * 3,
        compiler_params=_compiler_params(),
    )(x, ca.reshape(N, 1, CP), w1, b1.reshape(1, CP), w2, b2.reshape(1, CP),
      wsp.reshape(1, CP), bsp.reshape(1, 1))


# ----------------------------- parameters ------------------------------

def _place_vec(v, cpad, off=0):
    return jnp.zeros((cpad,), jnp.float32).at[off:off + v.shape[0]].set(v)


def _place_1x1(w, cpad, out_off=0):
    cin, cout = w.shape
    return jnp.zeros((cpad, cpad), jnp.float32).at[:cin, out_off:out_off + cout].set(w)


def _place_3x3(w, cpad, out_off=0, in_rotate=0):
    # w: (3,3,cin,cout).  in_rotate permutes the input channels so the padded
    # weight matches the lane layout produced by a fused (residual-add) concat.
    if in_rotate:
        w = jnp.concatenate([w[:, :, in_rotate:, :], w[:, :, :in_rotate, :]], axis=2)
    _, _, cin, cout = w.shape
    wp = jnp.zeros((9, cpad, cpad), jnp.float32)
    return wp.at[:, :cin, out_off:out_off + cout].set(w.reshape(9, cin, cout))


def _conv_init(key, cin, cout, k):
    kw, kb = jax.random.split(key)
    bound = 1.0 / float(cin * k * k) ** 0.5
    w = jax.random.uniform(kw, (k, k, cin, cout), jnp.float32, -bound, bound)
    b = jax.random.uniform(kb, (cout,), jnp.float32, -bound, bound)
    return w, b


def init_params(key, in_channels, out_channels, growth_rate, n_layers):
    C, O, g, L = in_channels, out_channels, growth_rate, n_layers
    total = 3 * C + L * g
    cpad = _round_up(max(total, O, C), LANE)
    keys = iter(jax.random.split(key, 8 + 2 * L))

    raw = {}
    w, b = _conv_init(next(keys), C, O, 1); raw["pix_w1"], raw["pix_b1"] = w.reshape(C, O), b
    w, b = _conv_init(next(keys), O, C, 1); raw["pix_w2"], raw["pix_b2"] = w.reshape(O, C), b
    # TODO(synk): ChannelAttention / SpatialAttention class defs were not provided;
    # implemented as the AttentionModule 'channel' / 'spatial' variants returning the
    # attention map (FourBranchModule.forward multiplies it with x).
    w, b = _conv_init(next(keys), C, C, 1); raw["ch_w"], raw["ch_b"] = w.reshape(C, C), b
    w, b = _conv_init(next(keys), C, 1, 1); raw["sp_w"], raw["sp_b"] = w.reshape(C, 1), b
    raw["conv1_w"], raw["conv1_b"] = _conv_init(next(keys), C, C, 3)
    raw["conv2_w"], raw["conv2_b"] = _conv_init(next(keys), 2 * C, 2 * C, 3)
    raw["conv3_w"], raw["conv3_b"] = _conv_init(next(keys), 3 * C, 3 * C, 3)
    raw["dense"] = []
    cin = 3 * C
    for _ in range(L):
        w3, b3 = _conv_init(next(keys), cin, g, 3)
        w1, b1 = _conv_init(next(keys), g, g, 1)
        raw["dense"].append(dict(
            bn1_gamma=jnp.ones((cin,), jnp.float32), bn1_beta=jnp.zeros((cin,), jnp.float32),
            conv3_w=w3, conv3_b=b3,
            bn2_gamma=jnp.ones((g,), jnp.float32), bn2_beta=jnp.zeros((g,), jnp.float32),
            conv1_w=w1.reshape(g, g), conv1_b=b1))
        cin += g

    # ----- lane-padded / lane-placed parameters used by the Pallas kernels -----
    p = {"cfg": dict(C=C, O=O, g=g, L=L, cpad=cpad, total=total), "raw": raw}
    p["pix_w1"] = _place_1x1(raw["pix_w1"], cpad); p["pix_b1"] = _place_vec(raw["pix_b1"], cpad)
    p["pix_w2"] = _place_1x1(raw["pix_w2"], cpad); p["pix_b2"] = _place_vec(raw["pix_b2"], cpad)
    p["ch_w"] = _place_1x1(raw["ch_w"], cpad);     p["ch_b"] = _place_vec(raw["ch_b"], cpad)
    p["sp_w"] = _place_vec(raw["sp_w"][:, 0], cpad)        # row vector for the VPU reduce
    p["sp_b"] = raw["sp_b"]                                # scalar bias, shape (1,)
    # conv1 writes its C output channels at lanes [C, 2C); fused residual add of
    # branch2 (lanes [0, C)) yields cat([out1, branch2]) in a permuted lane order
    # that conv2's weight rows are rotated to expect (in_rotate), and so on.
    p["conv1_w"] = _place_3x3(raw["conv1_w"], cpad, out_off=C)
    p["conv1_b"] = _place_vec(raw["conv1_b"], cpad, off=C)
    p["conv2_w"] = _place_3x3(raw["conv2_w"], cpad, out_off=C, in_rotate=C)
    p["conv2_b"] = _place_vec(raw["conv2_b"], cpad, off=C)
    p["conv3_w"] = _place_3x3(raw["conv3_w"], cpad, out_off=0, in_rotate=2 * C)
    p["conv3_b"] = _place_vec(raw["conv3_b"], cpad, off=0)
    dense = []
    cin = 3 * C
    for lr in raw["dense"]:
        dense.append(dict(
            bn1_gamma=_place_vec(lr["bn1_gamma"], cpad), bn1_beta=_place_vec(lr["bn1_beta"], cpad),
            conv3_w=_place_3x3(lr["conv3_w"], cpad),     conv3_b=_place_vec(lr["conv3_b"], cpad),
            bn2_gamma=_place_vec(lr["bn2_gamma"], cpad), bn2_beta=_place_vec(lr["bn2_beta"], cpad),
            # the 1x1 conv writes its g channels at lane offset `cin`; with the
            # fused residual add of h this is exactly torch.cat([h, y], dim=1).
            conv1_w=_place_1x1(lr["conv1_w"], cpad, out_off=cin),
            conv1_b=_place_vec(lr["conv1_b"], cpad, off=cin)))
        cin += g
    p["dense"] = dense
    return p


# ----------------------------- forward ------------------------------

def _bn_fold(x, gamma_pad, beta_pad):
    """Training-mode BatchNorm2d (batch stats, biased var) folded to scale/shift."""
    mean = x.mean(axis=(0, 1, 2))
    var = x.var(axis=(0, 1, 2))
    scale = gamma_pad * jax.lax.rsqrt(var + _BN_EPS)
    return scale, beta_pad - mean * scale


def four_branch_forward(params, x_nchw):
    cfg = params["cfg"]
    C, cpad, total = cfg["C"], cfg["cpad"], cfg["total"]

    x = jnp.transpose(x_nchw, (0, 2, 3, 1)).astype(jnp.float32)        # NCHW -> NHWC
    x = jnp.pad(x, ((0, 0), (0, 0), (0, 0), (0, cpad - C)))            # lane-pad channels

    # channel-attention vector: tiny per-image pooled reduction + 1x1 (JAX glue)
    pooled = x.mean(axis=(1, 2))
    ca = jax.nn.sigmoid(jnp.dot(pooled, params["ch_w"],
                                precision=jax.lax.Precision.HIGHEST) + params["ch_b"])

    # one pass over x -> all three attention branches
    branch1, branch2, branch3 = fused_attention_padded(
        x, ca, params["pix_w1"], params["pix_b1"], params["pix_w2"], params["pix_b2"],
        params["sp_w"], params["sp_b"])

    # out1 = conv1(branch1); torch.cat([out1, branch2]) fused as a residual add
    cat2 = conv3x3_padded(branch1, params["conv1_w"], params["conv1_b"], res=branch2)
    # out2 = conv2(cat2);   torch.cat([out2, branch3]) fused as a residual add
    cat3 = conv3x3_padded(cat2, params["conv2_w"], params["conv2_b"], res=branch3)
    # out3 = conv3(cat3)    (restores canonical channel order at lanes [0, 3C))
    h = conv3x3_padded(cat3, params["conv3_w"], params["conv3_b"])

    # dense block: BN+ReLU fused into the convs, torch.cat fused as residual add
    for layer in params["dense"]:
        s1, t1 = _bn_fold(h, layer["bn1_gamma"], layer["bn1_beta"])
        y = conv3x3_padded(h, layer["conv3_w"], layer["conv3_b"], scale=s1, shift=t1)
        s2, t2 = _bn_fold(y, layer["bn2_gamma"], layer["bn2_beta"])
        h = bn_conv1x1_res_padded(y, s2, t2, layer["conv1_w"], layer["conv1_b"], h)

    return jnp.transpose(h[..., :total], (0, 3, 1, 2))                 # NHWC -> NCHW


# ----------------------------- pure-JAX reference ------------------------------

def _ref_forward(raw, x_nchw):
    """Plain-XLA reference of FourBranchModule.forward (for validation)."""
    P = jax.lax.Precision.HIGHEST
    x = jnp.transpose(x_nchw, (0, 2, 3, 1)).astype(jnp.float32)

    def conv3(x, w, b):
        return jax.lax.conv_general_dilated(
            x, w, (1, 1), ((1, 1), (1, 1)),
            dimension_numbers=("NHWC", "HWIO", "NHWC"), precision=P) + b

    def conv1(x, w, b):
        return jnp.einsum("nhwc,cd->nhwd", x, w, precision=P) + b

    def bn_relu(x, gamma, beta):
        m = x.mean(axis=(0, 1, 2)); v = x.var(axis=(0, 1, 2))
        return jnp.maximum((x - m) * jax.lax.rsqrt(v + _BN_EPS) * gamma + beta, 0.0)

    b1 = x * jax.nn.sigmoid(conv1(conv1(x, raw["pix_w1"], raw["pix_b1"]),
                                  raw["pix_w2"], raw["pix_b2"]))
    out1 = conv3(b1, raw["conv1_w"], raw["conv1_b"])
    b2 = x * jax.nn.sigmoid(conv1(x.mean(axis=(1, 2), keepdims=True),
                                  raw["ch_w"], raw["ch_b"]))
    out2 = conv3(jnp.concatenate([out1, b2], -1), raw["conv2_w"], raw["conv2_b"])
    b3 = x * jax.nn.sigmoid(conv1(x, raw["sp_w"], raw["sp_b"]))
    h = conv3(jnp.concatenate([out2, b3], -1), raw["conv3_w"], raw["conv3_b"])
    for lyr in raw["dense"]:
        t = bn_relu(h, lyr["bn1_gamma"], lyr["bn1_beta"])
        t = conv3(t, lyr["conv3_w"], lyr["conv3_b"])
        t = bn_relu(t, lyr["bn2_gamma"], lyr["bn2_beta"])
        t = conv1(t, lyr["conv1_w"], lyr["conv1_b"])
        h = jnp.concatenate([h, t], -1)
    return jnp.transpose(h, (0, 3, 1, 2))


# ----------------------------- main ------------------------------

if __name__ == "__main__":
    key = jax.random.PRNGKey(0)
    kx, kp = jax.random.split(key)

    N, C, H, W = 2, 4, 16, 16
    out_channels, growth_rate, n_layers = 8, 4, 2

    x = jax.random.normal(kx, (N, C, H, W), jnp.float32)
    params = init_params(kp, C, out_channels, growth_rate, n_layers)

    out = jax.block_until_ready(four_branch_forward(params, x))

    expected_channels = 3 * C + n_layers * growth_rate
    assert out.shape == (N, expected_channels, H, W), out.shape
    assert bool(jnp.all(jnp.isfinite(out)))

    # numerical check against a plain-XLA reference of the module
    ref = jax.block_until_ready(_ref_forward(params["raw"], x))
    assert bool(jnp.allclose(out, ref, rtol=1e-2, atol=5e-2)), \
        float(jnp.max(jnp.abs(out - ref)))

    print("KERNEL_OK")
</pallas_src>

<mosaic_0001>
module attributes {stable_mosaic.version = 11 : i64} {
  func.func @kernel(%arg0: i32, %arg1: memref<1x16x16x128xf32, #tpu.memory_space<vmem>>, %arg2: memref<1x1x128xf32, #tpu.memory_space<vmem>>, %arg3: memref<128x128xf32, #tpu.memory_space<vmem>>, %arg4: memref<1x128xf32, #tpu.memory_space<vmem>>, %arg5: memref<128x128xf32, #tpu.memory_space<vmem>>, %arg6: memref<1x128xf32, #tpu.memory_space<vmem>>, %arg7: memref<1x128xf32, #tpu.memory_space<vmem>>, %arg8: memref<1x1xf32, #tpu.memory_space<vmem>>, %arg9: memref<1x16x16x128xf32, #tpu.memory_space<vmem>>, %arg10: memref<1x16x16x128xf32, #tpu.memory_space<vmem>>, %arg11: memref<1x16x16x128xf32, #tpu.memory_space<vmem>>) attributes {dimension_semantics = [#tpu.dimension_semantics<parallel>], iteration_bounds = array<i64: 2>, scalar_prefetch = 0 : i64, scratch_operands = 0 : i64, tpu.core_type = #tpu.core_type<tc>, window_params = [{transform_indices = @transform_0, window_bounds = array<i64: 1, 16, 16, 128>}, {transform_indices = @transform_1, window_bounds = array<i64: 1, 1, 128>}, {pipeline_mode = #tpu.pipeline_mode<synchronous>, transform_indices = @transform_2, window_bounds = array<i64: 128, 128>}, {pipeline_mode = #tpu.pipeline_mode<synchronous>, transform_indices = @transform_3, window_bounds = array<i64: 1, 128>}, {pipeline_mode = #tpu.pipeline_mode<synchronous>, transform_indices = @transform_4, window_bounds = array<i64: 128, 128>}, {pipeline_mode = #tpu.pipeline_mode<synchronous>, transform_indices = @transform_5, window_bounds = array<i64: 1, 128>}, {pipeline_mode = #tpu.pipeline_mode<synchronous>, transform_indices = @transform_6, window_bounds = array<i64: 1, 128>}, {pipeline_mode = #tpu.pipeline_mode<synchronous>, transform_indices = @transform_7, window_bounds = array<i64: 1, 1>}, {transform_indices = @transform_8, window_bounds = array<i64: 1, 16, 16, 128>}, {transform_indices = @transform_9, window_bounds = array<i64: 1, 16, 16, 128>}, {transform_indices = @transform_10, window_bounds = array<i64: 1, 16, 16, 128>}]} {
    %c0 = arith.constant 0 : index
    %c0_0 = arith.constant 0 : index
    %c0_1 = arith.constant 0 : index
    %c0_2 = arith.constant 0 : index
    %0 = vector.load %arg1[%c0, %c0_0, %c0_1, %c0_2] : memref<1x16x16x128xf32, #tpu.memory_space<vmem>>, vector<1x16x16x128xf32>
    %1 = vector.shape_cast %0 : vector<1x16x16x128xf32> to vector<16x16x128xf32>
    %2 = vector.shape_cast %1 : vector<16x16x128xf32> to vector<256x128xf32>
    %c0_3 = arith.constant 0 : index
    %c0_4 = arith.constant 0 : index
    %3 = vector.load %arg3[%c0_3, %c0_4] : memref<128x128xf32, #tpu.memory_space<vmem>>, vector<128x128xf32>
    %cst = arith.constant dense<0.000000e+00> : vector<256x128xf32>
    %4 = tpu.matmul %2, %3, %cst {dimension_numbers = #tpu.dot_dimension_numbers<[1], [0], [0], [1], [0, 0, 1, 1], [], []>} : vector<256x128xf32>, vector<128x128xf32>, vector<256x128xf32> -> vector<256x128xf32>
    %c0_5 = arith.constant 0 : index
    %c0_6 = arith.constant 0 : index
    %5 = vector.load %arg4[%c0_5, %c0_6] : memref<1x128xf32, #tpu.memory_space<vmem>>, vector<1x128xf32>
    %6 = vector.broadcast %5 : vector<1x128xf32> to vector<256x128xf32>
    %7 = arith.addf %4, %6 : vector<256x128xf32>
    %c0_7 = arith.constant 0 : index
    %c0_8 = arith.constant 0 : index
    %8 = vector.load %arg5[%c0_7, %c0_8] : memref<128x128xf32, #tpu.memory_space<vmem>>, vector<128x128xf32>
    %cst_9 = arith.constant dense<0.000000e+00> : vector<256x128xf32>
    %9 = tpu.matmul %7, %8, %cst_9 {dimension_numbers = #tpu.dot_dimension_numbers<[1], [0], [0], [1], [0, 0, 1, 1], [], []>} : vector<256x128xf32>, vector<128x128xf32>, vector<256x128xf32> -> vector<256x128xf32>
    %c0_10 = arith.constant 0 : index
    %c0_11 = arith.constant 0 : index
    %10 = vector.load %arg6[%c0_10, %c0_11] : memref<1x128xf32, #tpu.memory_space<vmem>>, vector<1x128xf32>
    %11 = vector.broadcast %10 : vector<1x128xf32> to vector<256x128xf32>
    %12 = arith.addf %9, %11 : vector<256x128xf32>
    %13 = arith.negf %12 : vector<256x128xf32>
    %14 = math.exp %13 : vector<256x128xf32>
    %cst_12 = arith.constant 1.000000e+00 : f32
    %15 = vector.broadcast %cst_12 : f32 to vector<256x128xf32>
    %16 = arith.addf %15, %14 : vector<256x128xf32>
    %17 = arith.divf %15, %16 : vector<256x128xf32>
    %18 = arith.mulf %2, %17 : vector<256x128xf32>
    %19 = vector.shape_cast %18 : vector<256x128xf32> to vector<16x16x128xf32>
    %c0_13 = arith.constant 0 : index
    %c0_14 = arith.constant 0 : index
    %c0_15 = arith.constant 0 : index
    %c0_16 = arith.constant 0 : index
    %20 = vector.load %arg9[%c0_13, %c0_14, %c0_15, %c0_16] : memref<1x16x16x128xf32, #tpu.memory_space<vmem>>, vector<1x16x16x128xf32>
    %21 = vector.shape_cast %20 : vector<1x16x16x128xf32> to vector<16x16x128xf32>
    %22 = vector.shape_cast %19 : vector<16x16x128xf32> to vector<1x16x16x128xf32>
    tpu.vector_store %arg9[%c0_13, %c0_14, %c0_15, %c0_16], %22 {strides = array<i32>} : memref<1x16x16x128xf32, #tpu.memory_space<vmem>>, vector<1x16x16x128xf32>,
    %c0_17 = arith.constant 0 : index
    %c0_18 = arith.constant 0 : index
    %c0_19 = arith.constant 0 : index
    %23 = vector.load %arg2[%c0_17, %c0_18, %c0_19] : memref<1x1x128xf32, #tpu.memory_space<vmem>>, vector<1x1x128xf32>
    %24 = vector.shape_cast %23 : vector<1x1x128xf32> to vector<1x128xf32>
    %25 = vector.broadcast %24 : vector<1x128xf32> to vector<256x128xf32>
    %26 = arith.mulf %2, %25 : vector<256x128xf32>
    %27 = vector.shape_cast %26 : vector<256x128xf32> to vector<16x16x128xf32>
    %c0_20 = arith.constant 0 : index
    %c0_21 = arith.constant 0 : index
    %c0_22 = arith.constant 0 : index
    %c0_23 = arith.constant 0 : index
    %28 = vector.load %arg10[%c0_20, %c0_21, %c0_22, %c0_23] : memref<1x16x16x128xf32, #tpu.memory_space<vmem>>, vector<1x16x16x128xf32>
    %29 = vector.shape_cast %28 : vector<1x16x16x128xf32> to vector<16x16x128xf32>
    %30 = vector.shape_cast %27 : vector<16x16x128xf32> to vector<1x16x16x128xf32>
    tpu.vector_store %arg10[%c0_20, %c0_21, %c0_22, %c0_23], %30 {strides = array<i32>} : memref<1x16x16x128xf32, #tpu.memory_space<vmem>>, vector<1x16x16x128xf32>,
    %c0_24 = arith.constant 0 : index
    %c0_25 = arith.constant 0 : index
    %31 = vector.load %arg7[%c0_24, %c0_25] : memref<1x128xf32, #tpu.memory_space<vmem>>, vector<1x128xf32>
    %32 = vector.broadcast %31 : vector<1x128xf32> to vector<256x128xf32>
    %33 = arith.mulf %2, %32 : vector<256x128xf32>
    %cst_26 = arith.constant dense<0.000000e+00> : vector<256xf32>
    %34 = vector.multi_reduction <add>, %33, %cst_26 [1] : vector<256x128xf32> to vector<256xf32>
    %35 = vector.shape_cast %34 : vector<256xf32> to vector<256x1xf32>
    %c0_27 = arith.constant 0 : index
    %c0_28 = arith.constant 0 : index
    %36 = vector.load %arg8[%c0_27, %c0_28] : memref<1x1xf32, #tpu.memory_space<vmem>>, vector<1x1xf32>
    %37 = vector.broadcast %36 : vector<1x1xf32> to vector<256x1xf32>
    %38 = arith.addf %35, %37 : vector<256x1xf32>
    %39 = arith.negf %38 : vector<256x1xf32>
    %40 = math.exp %39 : vector<256x1xf32>
    %cst_29 = arith.constant 1.000000e+00 : f32
    %41 = vector.broadcast %cst_29 : f32 to vector<256x1xf32>
    %42 = arith.addf %41, %40 : vector<256x1xf32>
    %43 = arith.divf %41, %42 : vector<256x1xf32>
    %44 = vector.broadcast %43 : vector<256x1xf32> to vector<256x128xf32>
    %45 = arith.mulf %2, %44 : vector<256x128xf32>
    %46 = vector.shape_cast %45 : vector<256x128xf32> to vector<16x16x128xf32>
    %c0_30 = arith.constant 0 : index
    %c0_31 = arith.constant 0 : index
    %c0_32 = arith.constant 0 : index
    %c0_33 = arith.constant 0 : index
    %47 = vector.load %arg11[%c0_30, %c0_31, %c0_32, %c0_33] : memref<1x16x16x128xf32, #tpu.memory_space<vmem>>, vector<1x16x16x128xf32>
    %48 = vector.shape_cast %47 : vector<1x16x16x128xf32> to vector<16x16x128xf32>
    %49 = vector.shape_cast %46 : vector<16x16x128xf32> to vector<1x16x16x128xf32>
    tpu.vector_store %arg11[%c0_30, %c0_31, %c0_32, %c0_33], %49 {strides = array<i32>} : memref<1x16x16x128xf32, #tpu.memory_space<vmem>>, vector<1x16x16x128xf32>,
    return
  }
  func.func @transform_0(%arg0: i32) -> (i32, i32, i32, i32) {
    %c0_i32 = arith.constant 0 : i32
    %c0_i32_0 = arith.constant 0 : i32
    %c0_i32_1 = arith.constant 0 : i32
    %c0_i32_2 = arith.constant 0 : i32
    return %arg0, %c0_i32, %c0_i32_0, %c0_i32_1 : i32, i32, i32, i32
  }
  func.func @transform_1(%arg0: i32) -> (i32, i32, i32) {
    %c0_i32 = arith.constant 0 : i32
    %c0_i32_0 = arith.constant 0 : i32
    %c0_i32_1 = arith.constant 0 : i32
    return %arg0, %c0_i32, %c0_i32_0 : i32, i32, i32
  }
  func.func @transform_2(%arg0: i32) -> (i32, i32) {
    %c0_i32 = arith.constant 0 : i32
    %c0_i32_0 = arith.constant 0 : i32
    %c0_i32_1 = arith.constant 0 : i32
    return %c0_i32, %c0_i32_0 : i32, i32
  }
  func.func @transform_3(%arg0: i32) -> (i32, i32) {
    %c0_i32 = arith.constant 0 : i32
    %c0_i32_0 = arith.constant 0 : i32
    %c0_i32_1 = arith.constant 0 : i32
    return %c0_i32, %c0_i32_0 : i32, i32
  }
  func.func @transform_4(%arg0: i32) -> (i32, i32) {
    %c0_i32 = arith.constant 0 : i32
    %c0_i32_0 = arith.constant 0 : i32
    %c0_i32_1 = arith.constant 0 : i32
    return %c0_i32, %c0_i32_0 : i32, i32
  }
  func.func @transform_5(%arg0: i32) -> (i32, i32) {
    %c0_i32 = arith.constant 0 : i32
    %c0_i32_0 = arith.constant 0 : i32
    %c0_i32_1 = arith.constant 0 : i32
    return %c0_i32, %c0_i32_0 : i32, i32
  }
  func.func @transform_6(%arg0: i32) -> (i32, i32) {
    %c0_i32 = arith.constant 0 : i32
    %c0_i32_0 = arith.constant 0 : i32
    %c0_i32_1 = arith.constant 0 : i32
    return %c0_i32, %c0_i32_0 : i32, i32
  }
  func.func @transform_7(%arg0: i32) -> (i32, i32) {
    %c0_i32 = arith.constant 0 : i32
    %c0_i32_0 = arith.constant 0 : i32
    %c0_i32_1 = arith.constant 0 : i32
    return %c0_i32, %c0_i32_0 : i32, i32
  }
  func.func @transform_8(%arg0: i32) -> (i32, i32, i32, i32) {
    %c0_i32 = arith.constant 0 : i32
    %c0_i32_0 = arith.constant 0 : i32
    %c0_i32_1 = arith.constant 0 : i32
    %c0_i32_2 = arith.constant 0 : i32
    return %arg0, %c0_i32, %c0_i32_0, %c0_i32_1 : i32, i32, i32, i32
  }
  func.func @transform_9(%arg0: i32) -> (i32, i32, i32, i32) {
    %c0_i32 = arith.constant 0 : i32
    %c0_i32_0 = arith.constant 0 : i32
    %c0_i32_1 = arith.constant 0 : i32
    %c0_i32_2 = arith.constant 0 : i32
    return %arg0, %c0_i32, %c0_i32_0, %c0_i32_1 : i32, i32, i32, i32
  }
  func.func @transform_10(%arg0: i32) -> (i32, i32, i32, i32) {
    %c0_i32 = arith.constant 0 : i32
    %c0_i32_0 = arith.constant 0 : i32
    %c0_i32_1 = arith.constant 0 : i32
    %c0_i32_2 = arith.constant 0 : i32
    return %arg0, %c0_i32, %c0_i32_0, %c0_i32_1 : i32, i32, i32, i32
  }
}

</mosaic_0001>

<bundles_post_ra>
// kernel: tpu_custom_call.1
= control target key start
LH: loop header
LB: loop body
LE: loop exit
PB: predicated region body
PF: predicated region fallthrough
CT: control target
= control target key end

     0   :  { %s4125_s0 = inlined_call_operand.hbm [shape: f32[2,16,16,128], index: 0, kind: input, shape index: {}]   ;;  %s4126_s1 = inlined_call_operand.vmem [shape: f32[2,1,128], index: 1, kind: input, shape index: {}]   ;;  %s4127_s2 = inlined_call_operand.hbm [shape: f32[128,128], index: 2, kind: input, shape index: {}]   ;;  %s4128_s3 = inlined_call_operand.vmem [shape: f32[1,128], index: 3, kind: input, shape index: {}]   ;;  %s4129_s4 = inlined_call_operand.hbm [shape: f32[128,128], index: 4, kind: input, shape index: {}]   ;;  %s4130_s5 = inlined_call_operand.vmem [shape: f32[1,128], index: 5, kind: input, shape index: {}]   ;;  %s4131_s6 = inlined_call_operand.vmem [shape: f32[1,128], index: 6, kind: input, shape index: {}]   ;;  %s4132_s7 = inlined_call_operand.<no memory space> [shape: f32[1,1], index: 7, kind: input, shape index: {}]   ;;  %s4133_s8 = inlined_call_operand.hbm [shape: f32[2,16,16,128], index: 8, kind: output, shape index: {0}]   ;;  %s4134_s9 = inlined_call_operand.hbm [shape: f32[2,16,16,128], index: 9, kind: output, shape index: {1}]   ;;  %s4135_s10 = inlined_call_operand.hbm [shape: f32[2,16,16,128], index: 10, kind: output, shape index: {2}]  }
   0x1   :  { %4143 = sst [smem:[#allocation18_spill]] %s4125_s0  ;;  %v16_v0 = vstv %s4132_s7 }
   0x2   :  { %4144 = sst [smem:[#allocation19_spill]] %s4126_s1  ;;  %17 = vst [vmem:[#allocation2] sm:$0x1] %v16_v0 }
   0x3   :  { %18 = vsyncpa [#allocation4], 0 }
   0x4   :  { %20 = vsyncpa [#allocation4 + $0x1], 0 }
   0x5   :  { %21 = vsyncpa [#allocation7], 0 }
   0x6   :  { %22 = vsyncpa [#allocation5], 0 }
   0x7   :  { %24 = vsyncpa [#allocation5 + $0x1], 0 }
   0x8   :  { %25 = vsyncpa [#allocation11], 0 }
   0x9   :  { %27 = vsyncpa [#allocation11 + $0x1], 0  ;;  %s3150_s15 = smov 0   ;;  %s3152_s16 = smov 0  }
   0xa   :  { %s3154_s17 = smov 0   ;;  %s3156_s18 = smov 0  }
   0xb LB: > { %s3171_s7 = sadd.s32 4294967295, %s3079_s18   ;;  %s4137_s19 = sadd.s32 4294967294, %s3079_s18   ;;  %s3079_s18 = sphi %s3156_s18, %s4168_s18   ;;  %s3075_s17 = sphi %s3154_s17, %s4167_s17   ;;  %s3071_s16 = sphi %s3152_s16, %s4166_s16   ;;  %s3067_s15 = sphi %s3150_s15, %s4165_s15  }
   0xc   : > { %p53_p0 = scmp.ne.s32.totalorder %s3071_s16, %s3067_s15  ;;  %p4136_p1 = scmp.eq.s32.totalorder %s3171_s7, 0 }
   0xd   : > { %p235_p3 = scmp.eq.s32.totalorder %s4137_s19, 1  ;;  %p2073_p5 = scmp.ge.s32.totalorder %s3079_s18, 1 }
   0xe   : > { %p3182_p4 = por %p4136_p1, %p53_p0  ;;  %p294_p7 = scmp.lt.s32.totalorder %s3079_s18, 3 }
   0xf   : > { %p3187_p6 = por %p235_p3, %p53_p0  ;;  %s3081_s23 = smov [#allocation6]  }
  0x10   : > { %s4145_s20 = scalar_select %p3182_p4, 1, 0 }
  0x11   : > { %s4146_s21 = scalar_select %p3187_p6, 1, 0 }
  0x12   : > { %p3192_p8 = pnand %p2073_p5, %p294_p7  ;;  %s306_s24 = sshll.u32 %s3081_s23, 4  ;;  %s3196_s24 = int_to_ptr.vmem [resolvable:$true] %s306_s24 }
  0x13   : > { %4147 = sst [smem:[#allocation17_spill]] %s4146_s21  ;;  %s3082_s26 = smov [#allocation8]  }
  0x14   : > { %p2507_p9 = pneg %p3192_p8  ;;  %s322_s27 = sshll.u32 %s3082_s26, 4  ;;  %s3207_s27 = int_to_ptr.vmem [resolvable:$true] %s322_s27 }
  0x15   : > { %s2863_s30 = scalar_lea.hbm %s4127_s2, 2048 }
  0x16   : > { %p3203_p11 = pnand %p2507_p9, %p4136_p1  ;;  %p2864_p12 = scmp.ne.s32.totalorder %s4127_s2, %s2863_s30 }
  0x17   : > { %p2870_p5 = scmp.lt.u32.totalorder %s2863_s30, %s4127_s2 }
  0x18   : > { %p2865_p13 = pneg %p3203_p11 }
  0x1a   : > { %p2866_p0 = pnand %p2865_p13, %p2864_p12 }
  0x1c   : > { %p2867_p3 = pneg %p2866_p0 }
  0x1e   : > { %p2872_p7 = pnand %p2870_p5, %p2867_p3 }
  0x20   : > { %2875 = shalt.err (!%p2872_p7)
}
  0x21   : > { %s2876_s23 = scalar_lea.vmem %s3196_s24, 2048  ;;  %p2884_p2 = scmp.lt.s32.totalorder %s3196_s24, %s3196_s24 }
  0x22   : > { %p2877_p9 = scmp.ne.s32.totalorder %s3196_s24, %s2876_s23  ;;  %p2885_p12 = scmp.lt.s32.totalorder %s2876_s23, %s2876_s23 }
  0x24   : > { %p2879_p10 = pnand %p2877_p9, %p2865_p13  ;;  %p2886_p0 = por %p2885_p12, %p2884_p2 }
  0x26   : > { %p2880_p1 = pneg %p2879_p10 }
  0x28   : > { %p2887_p6 = pnand %p2886_p0, %p2880_p1 }
  0x2a   : > { %2890 = shalt.err (!%p2887_p6)
}
  0x2b   : > { %s4139_s26 = smov 128   ;;  %s4140_s28 = smov 8  }
  0x2c   : > { %2510 = dma.hbm_to_vmem [thread:$0]  (!%p3203_p11), %s4127_s2, 2048, %s3196_s24, [#allocation7], %s4139_s26, %s4139_s26, %s4140_s28  }
  0x2d   : > { %s2891_s13 = scalar_lea.hbm %s4129_s4, 2048 }
  0x2e   : > { %p2892_p1 = scmp.ne.s32.totalorder %s4129_s4, %s2891_s13  ;;  %p2898_p10 = scmp.lt.u32.totalorder %s2891_s13, %s4129_s4 }
  0x30   : > { %p2894_p2 = pnand %p2892_p1, %p2865_p13 }
  0x32   : > { %p2895_p6 = pneg %p2894_p2 }
  0x34   : > { %p2900_p3 = pnand %p2898_p10, %p2895_p6 }
  0x36   : > { %2903 = shalt.err (!%p2900_p3)
}
  0x37   : > { %s2904_s24 = scalar_lea.vmem %s3207_s27, 2048  ;;  %p2912_p12 = scmp.lt.s32.totalorder %s3207_s27, %s3207_s27 }
  0x38   : > { %p2905_p5 = scmp.ne.s32.totalorder %s3207_s27, %s2904_s24  ;;  %p2913_p0 = scmp.lt.s32.totalorder %s2904_s24, %s2904_s24 }
  0x3a   : > { %p2907_p7 = pnand %p2905_p5, %p2865_p13  ;;  %p2914_p1 = por %p2913_p0, %p2912_p12 }
  0x3c   : > { %p2908_p9 = pneg %p2907_p7 }
  0x3e   : > { %p2915_p2 = pnand %p2914_p1, %p2908_p9 }
  0x40   : > { %2918 = shalt.err (!%p2915_p2)
}
  0x41   : > { %2513 = dma.hbm_to_vmem [thread:$0]  (!%p3203_p11), %s4129_s4, 2048, %s3207_s27, [#allocation7], %s4139_s26, %s4139_s26, %s4140_s28  }
  0x42   : > { %s3268_s25 = sadd.s32 1, %s3079_s18   ;;  %s40_s29 = sadd.s32 1, %s3075_s17 }
  0x43   : > { %s37_s30 = ssub.s32 %s3079_s18, %s3268_s25  ;;  %p47_p13 = scmp.ne.s32.totalorder %s3075_s17, %s3071_s16 }
  0x44   : > { %p38_p6 = scmp.eq.s32.totalorder %s37_s30, 0  ;;  %p48_p10 = scmp.eq.s32.totalorder %s3079_s18, 0 }
  0x45   : > { %p4150_p3 = scmp.eq.s32.totalorder %s3171_s7, 1  ;;  %p2530_p7 = scmp.lt.s32.totalorder %s3079_s18, 2 }
  0x46   : > { %s3284_s12 = scalar_select %p38_p6, %s3075_s17, %s40_s29  }
  0x47   : > { %p3278_p5 = por %p4150_p3, %p47_p13  ;;  %p49_p9 = por %p48_p10, %p47_p13 }
  0x48   : > { %s345_s13 = sand.u32 1, %s3075_s17   ;;  %s2167_s27 = sshll.u32 %s3079_s18, 12 }
  0x49   : > { %s4151_s11 = scalar_select %p3278_p5, 1, 0 }
  0x4a   : > { %s2077_s14 = sshll.u32 %s345_s13, 8  ;;  %s4152_s0 = sld [smem:[#allocation18_spill]] }
  0x4b   : > { %s349_s21 = scalar_lea.vmem [#allocation3], %s2077_s14  ;;  %p3295_p11 = pnand %p2530_p7, %p49_p9 }
  0x4c   : > { %s356_s30 = sshll.u32 %s349_s21, 4  ;;  %s3299_s26 = scalar_lea.sflag [#allocation4], %s345_s13  ;;  %s3293_s30 = int_to_ptr.vmem [resolvable:$true] %s356_s30 }
  0x4d   : > { %p2921_p0 = pneg %p3295_p11 }
  0x50   : > { %s3291_s19 = scalar_lea.hbm %s4152_s0, %s2167_s27  ;;  %s2924_s23 = scalar_lea.hbm %s4152_s0, 8192 }
  0x51   : > { %s2919_s28 = scalar_lea.hbm %s3291_s19, 4096  ;;  %p2925_p13 = scmp.lt.u32.totalorder %s3291_s19, %s4152_s0 }
  0x52   : > { %p2920_p12 = scmp.ne.s32.totalorder %s3291_s19, %s2919_s28  ;;  %p2926_p6 = scmp.lt.u32.totalorder %s2924_s23, %s2919_s28 }
  0x53   : > { %p2928_p3 = scmp.lt.u32.totalorder %s2919_s28, %s3291_s19 }
  0x54   : > { %p2922_p1 = pnand %p2921_p0, %p2920_p12  ;;  %p2927_p10 = por %p2926_p6, %p2925_p13 }
  0x56   : > { %p2923_p2 = pneg %p2922_p1  ;;  %p2929_p7 = por %p2928_p3, %p2927_p10 }
  0x58   : > { %p2930_p9 = pnand %p2929_p7, %p2923_p2 }
  0x5a   : > { %2933 = shalt.err (!%p2930_p9)
}
  0x5b   : > { %s2934_s13 = scalar_lea.vmem %s3293_s30, 4096  ;;  %s3085_s14 = smov [#allocation3]  }
  0x5c   : > { %p2935_p12 = scmp.ne.s32.totalorder %s3293_s30, %s2934_s13  ;;  %s2939_s27 = sshll.u32 %s3085_s14, 4  ;;  %s2940_s27 = int_to_ptr.vmem [resolvable:$false] %s2939_s27 }
  0x5d   : > { %s2941_s24 = scalar_lea.vmem %s2940_s27, 8192  ;;  %p2942_p4 = scmp.lt.s32.totalorder %s3293_s30, %s2940_s27 }
  0x5e   : > { %p2937_p1 = pnand %p2935_p12, %p2921_p0  ;;  %p2943_p13 = scmp.lt.s32.totalorder %s2941_s24, %s2934_s13 }
  0x60   : > { %p2938_p5 = pneg %p2937_p1  ;;  %p2944_p6 = por %p2943_p13, %p2942_p4 }
  0x62   : > { %p2945_p10 = pnand %p2944_p6, %p2938_p5 }
  0x64   : > { %2948 = shalt.err (!%p2945_p10)
}
  0x65   : > { %s4154_s28 = smov 8   ;;  %s4155_s23 = smov 128  }
  0x66   : > { %2517 = dma.hbm_to_vmem [thread:$0]  (!%p3295_p11), %s3291_s19, 4096, %s3293_s30, %s3299_s26, %s4155_s23, %s4155_s23, %s4154_s28  }
  0x67   : > { %374 = sbr.rel (%p3192_p8) target bundleno = 685 (0x2ad), region = 52  ;;  %s3333_s21 = sand.u32 (!%p3192_p8), 1, %s3071_s16  }
  0x68   : > { %s3336_s13 = sshll.u32 (!%p3192_p8), %s3333_s21, 8  ;;  %s377_s29 = scalar_lea.sflag (!%p3192_p8), [#allocation4], %s3333_s21 }
  0x69   : > { %s3340_s14 = scalar_lea.vmem (!%p3192_p8), [#allocation3], %s3336_s13  ;;  %p4156_p4 = scmp.ne.s32.totalorder (!%p3192_p8), %s4145_s20, 0 }
  0x6e   : > { %3050 = dma.done.wait (%p4156_p4), %s377_s29, 4096  }
  0x6f   : > { %3052 = vsyncadd (%p4156_p4), %s377_s29, 4294963200  ;;  %p4157_p5 = scmp.eq.s32.totalorder %s3171_s7, 0 }
  0x71   : > { %3054 = dma.done.wait (%p4157_p5), [#allocation7], 4096   ;;  %p4158_p8 = pmov %p4157_p5 }
  0x72   : > { %p438_p11 = scmp.lt.s32.totalorder %s3171_s7, 1  ;;  %v473_v1 = vld [vmem:[#allocation6] sm:$0xff]  ;;  %v474_v2 = vld [vmem:[#allocation6 + $0x8] sm:$0xff]  ;;  %v475_v3 = vld [vmem:[#allocation6 + $0x10] sm:$0xff]  ;;  %s4159_s1 = sld [smem:[#allocation19_spill]] }
  0x73   : > { %3056 = vsyncadd (%p4158_p8), [#allocation7], 4294963200  ;;  %v2427_v4 = vpack.c.bf16 %v474_v2, %v473_v1  ;;  %v476_v5 = vld [vmem:[#allocation6 + $0x18] sm:$0xff]  ;;  %v477_v7 = vld [vmem:[#allocation6 + $0x20] sm:$0xff]  ;;  %s3388_s30 = scalar_lea.vmem [#allocation10], %s3336_s13  ;;  %s3733_s29 = scalar_lea.vmem [#allocation12], %s3336_s13 }
  0x74   : > { %s439_s22 = scalar_select %p438_p11, %s3171_s7, 1  ;;  %v2431_v6 = vpack.c.bf16 %v476_v5, %v475_v3  ;;  %v478_v8 = vld [vmem:[#allocation6 + $0x28] sm:$0xff]  ;;  %v479_v9 = vld [vmem:[#allocation6 + $0x30] sm:$0xff]  ;;  %v480_v11 = vld [vmem:[#allocation6 + $0x38] sm:$0xff] }
  0x75   : > { %2428 = vmatprep.subr.bf16.mxu0 %v2427_v4  ;;  %v2435_v10 = vpack.c.bf16 %v478_v8, %v477_v7  ;;  %v3356_v12 = vld [vmem:[%s3340_s14] sm:$0xff]  ;;  %v3364_v15 = vld [vmem:[%s3340_s14 + $0x8] sm:$0xff]  ;;  %v3367_v16 = vld [vmem:[%s3340_s14 + $0x10] sm:$0xff]  ;;  %v3406_v32 = vpack.c.bf16 %v480_v11, %v479_v9  ;;  %s3893_s20 = sshll.u32 %s3171_s7, 12  ;;  %s1894_s24 = sshll.u32 %s3388_s30, 4  ;;  %s3902_s24 = int_to_ptr.vmem [resolvable:$true] %s1894_s24 }
  0x76   : > { %2430 = vmatpush3.bf16.msra.mxu0 %v2427_v4  ;;  %2299 = vmatprep.mubr.f32.mxu0 %v3356_v12  ;;  %v3370_v17 = vld [vmem:[%s3340_s14 + $0x18] sm:$0xff]  ;;  %v3379_v21 = vld [vmem:[%s3340_s14 + $0x20] sm:$0xff]  ;;  %v3382_v22 = vld [vmem:[%s3340_s14 + $0x28] sm:$0xff]  ;;  %s3899_s27 = scalar_lea.hbm %s4134_s9, %s3893_s20  ;;  %s2949_s28 = scalar_lea.vmem %s3902_s24, 4096 }
  0x77   : > { %2432 = vmatprep.subr.bf16.mxu0 %v2431_v6  ;;  %v3385_v23 = vld [vmem:[%s3340_s14 + $0x30] sm:$0xff]  ;;  %v481_v24 = vld [vmem:[#allocation6 + $0x40] sm:$0xff]  ;;  %v482_v25 = vld [vmem:[#allocation6 + $0x48] sm:$0xff]  ;;  %p2950_p0 = scmp.ne.s32.totalorder %s3902_s24, %s2949_s28  ;;  %p4160_p2 = scmp.ne.s32.totalorder %s4151_s11, 0 }
  0x78   : > { %s440_s19 = scalar_lea.vmem %s4159_s1, %s439_s22  ;;  %v3398_v29 = vld [vmem:[%s3340_s14 + $0x38] sm:$0xff]  ;;  %v3401_v30 = vld [vmem:[%s3340_s14 + $0x40] sm:$0xff]  ;;  %v3404_v31 = vld [vmem:[%s3340_s14 + $0x48] sm:$0xff]  ;;  %v2443_v59 = vpack.c.bf16 %v482_v25, %v481_v24  ;;  %s1859_s22 = sand.u32 1, %s3171_s7  }
  0x79   : > { %v3358_v13 = vld [vmem:[%s440_s19] ss:$0 sm:$0xff]  ;;  %v3418_v36 = vld [vmem:[%s3340_s14 + $0x50] sm:$0xff]  ;;  %v3424_v38 = vld [vmem:[%s3340_s14 + $0x60] sm:$0xff]  ;;  %p2951_p3 = pnand %p2950_p0, %p4160_p2  ;;  %s3087_s7 = smov [#allocation10]  }
  0x7a   : > { %v1232_v14 = vmul.f32 %v3358_v13, %v3356_v12  ;;  %v1233_v18 = vmul.f32 %v3358_v13, %v3364_v15  ;;  %v1234_v19 = vmul.f32 %v3358_v13, %v3367_v16  ;;  %v1235_v20 = vmul.f32 %v3358_v13, %v3370_v17  ;;  %2434 = vmatpush3.bf16.msra.mxu0 %v2431_v6  ;;  %v3421_v37 = vld [vmem:[%s3340_s14 + $0x58] sm:$0xff]  ;;  %v3436_v42 = vld [vmem:[%s3340_s14 + $0x68] sm:$0xff]  ;;  %v3439_v43 = vld [vmem:[%s3340_s14 + $0x70] sm:$0xff]  ;;  %s2953_s23 = sshll.u32 %s3087_s7, 4  ;;  %s2954_s23 = int_to_ptr.vmem [resolvable:$false] %s2953_s23 }
  0x7b   : > { %v1236_v26 = vmul.f32 %v3358_v13, %v3379_v21  ;;  %v1237_v27 = vmul.f32 %v3358_v13, %v3382_v22  ;;  %v1238_v28 = vmul.f32 %v3358_v13, %v3385_v23  ;;  %2436 = vmatprep.subr.bf16.mxu0 %v2435_v10  ;;  %v1239_v33 = vmul.f32 %v3358_v13, %v3398_v29  ;;  %v3442_v44 = vld [vmem:[%s3340_s14 + $0x78] sm:$0xff]  ;;  %v3454_v48 = vld [vmem:[%s3340_s14 + $0x80] sm:$0xff]  ;;  %v3457_v49 = vld [vmem:[%s3340_s14 + $0x88] sm:$0xff]  ;;  %p2952_p7 = pneg %p2951_p3  ;;  %s2955_s0 = scalar_lea.vmem %s2954_s23, 8192 }
  0x7c   : > { %1264 = vst [vmem:[%s3388_s30] sm:$0xff] %v1232_v14  ;;  %1265 = vst [vmem:[%s3388_s30 + $0x8] sm:$0xff] %v1233_v18  ;;  %v1240_v34 = vmul.f32 %v3358_v13, %v3401_v30  ;;  %v1241_v35 = vmul.f32 %v3358_v13, %v3404_v31  ;;  %v1242_v39 = vmul.f32 %v3358_v13, %v3418_v36  ;;  %v3460_v50 = vld [vmem:[%s3340_s14 + $0x90] sm:$0xff]  ;;  %v484_v52 = vld [vmem:[#allocation6 + $0x58] sm:$0xff]  ;;  %p2956_p9 = scmp.lt.s32.totalorder %s3902_s24, %s2954_s23  ;;  %p2957_p12 = scmp.lt.s32.totalorder %s2955_s0, %s2949_s28 }
  0x7d   : > { %1266 = vst [vmem:[%s3388_s30 + $0x10] sm:$0xff] %v1234_v19  ;;  %1267 = vst [vmem:[%s3388_s30 + $0x18] sm:$0xff] %v1235_v20  ;;  %v1243_v40 = vmul.f32 %v3358_v13, %v3421_v37  ;;  %v1244_v41 = vmul.f32 %v3358_v13, %v3424_v38  ;;  %v1245_v45 = vmul.f32 %v3358_v13, %v3436_v42  ;;  %v483_v51 = vld [vmem:[#allocation6 + $0x50] sm:$0xff]  ;;  %v3472_v56 = vld [vmem:[%s3340_s14 + $0x98] sm:$0xff] }
  0x7e   : > { %1268 = vst [vmem:[%s3388_s30 + $0x20] sm:$0xff] %v1236_v26  ;;  %1269 = vst [vmem:[%s3388_s30 + $0x28] sm:$0xff] %v1237_v27  ;;  %v1246_v46 = vmul.f32 %v3358_v13, %v3439_v43  ;;  %v1247_v47 = vmul.f32 %v3358_v13, %v3442_v44  ;;  %2438 = vmatpush3.bf16.msra.mxu0 %v2435_v10  ;;  %v1248_v53 = vmul.f32 %v3358_v13, %v3454_v48  ;;  %v3475_v57 = vld [vmem:[%s3340_s14 + $0xa0] sm:$0xff]  ;;  %v3478_v58 = vld [vmem:[%s3340_s14 + $0xa8] sm:$0xff]  ;;  %p2958_p1 = por %p2957_p12, %p2956_p9 }
  0x7f   : > { %1270 = vst [vmem:[%s3388_s30 + $0x30] sm:$0xff] %v1238_v28  ;;  %1271 = vst [vmem:[%s3388_s30 + $0x38] sm:$0xff] %v1239_v33  ;;  %v1249_v54 = vmul.f32 %v3358_v13, %v3457_v49  ;;  %v1250_v55 = vmul.f32 %v3358_v13, %v3460_v50  ;;  %2440 = vmatprep.subr.bf16.mxu0 %v3406_v32  ;;  %v1251_v60 = vmul.f32 %v3358_v13, %v3472_v56  ;;  %v3491_v63 = vld [vmem:[%s3340_s14 + $0xb0] sm:$0xff]  ;;  %v3494_v0 = vld [vmem:[%s3340_s14 + $0xb8] sm:$0xff] }
  0x80   : > { %1272 = vst [vmem:[%s3388_s30 + $0x40] sm:$0xff] %v1240_v34  ;;  %1273 = vst [vmem:[%s3388_s30 + $0x48] sm:$0xff] %v1241_v35  ;;  %v1252_v61 = vmul.f32 %v3358_v13, %v3475_v57  ;;  %v1253_v62 = vmul.f32 %v3358_v13, %v3478_v58  ;;  %v3497_v1 = vld [vmem:[%s3340_s14 + $0xc0] sm:$0xff]  ;;  %v1254_v2 = vmul.f32 %v3358_v13, %v3491_v63  ;;  %v3509_v5 = vld [vmem:[%s3340_s14 + $0xc8] sm:$0xff]  ;;  %p2959_p13 = pnand %p2958_p1, %p2952_p7 }
  0x81   : > { %1274 = vst [vmem:[%s3388_s30 + $0x50] sm:$0xff] %v1242_v39  ;;  %1275 = vst [vmem:[%s3388_s30 + $0x58] sm:$0xff] %v1243_v40  ;;  %v1255_v3 = vmul.f32 %v3358_v13, %v3494_v0  ;;  %v1256_v4 = vmul.f32 %v3358_v13, %v3497_v1  ;;  %v3512_v6 = vld [vmem:[%s3340_s14 + $0xd0] sm:$0xff]  ;;  %v3515_v7 = vld [vmem:[%s3340_s14 + $0xd8] sm:$0xff]  ;;  %v1257_v8 = vmul.f32 %v3358_v13, %v3509_v5 }
  0x82   : > { %1276 = vst [vmem:[%s3388_s30 + $0x60] sm:$0xff] %v1244_v41  ;;  %1277 = vst [vmem:[%s3388_s30 + $0x68] sm:$0xff] %v1245_v45  ;;  %v1258_v9 = vmul.f32 %v3358_v13, %v3512_v6  ;;  %v1259_v10 = vmul.f32 %v3358_v13, %v3515_v7  ;;  %v3527_v11 = vld [vmem:[%s3340_s14 + $0xe0] sm:$0xff]  ;;  %v3530_v14 = vld [vmem:[%s3340_s14 + $0xe8] sm:$0xff]  ;;  %2442 = vmatpush3.bf16.msra.mxu0 %v3406_v32  ;;  %v2447_v27 = vpack.c.bf16 %v484_v52, %v483_v51 }
  0x83   : > { %1278 = vst [vmem:[%s3388_s30 + $0x70] sm:$0xff] %v1246_v46  ;;  %1279 = vst [vmem:[%s3388_s30 + $0x78] sm:$0xff] %v1247_v47  ;;  %v3533_v18 = vld [vmem:[%s3340_s14 + $0xf0] sm:$0xff]  ;;  %v1260_v19 = vmul.f32 %v3358_v13, %v3527_v11  ;;  %v1261_v20 = vmul.f32 %v3358_v13, %v3530_v14  ;;  %v3546_v25 = vld [vmem:[%s3340_s14 + $0xf8] sm:$0xff]  ;;  %2444 = vmatprep.subr.bf16.mxu0 %v2443_v59 }
  0x84   : > { %1280 = vst [vmem:[%s3388_s30 + $0x80] sm:$0xff] %v1248_v53  ;;  %1281 = vst [vmem:[%s3388_s30 + $0x88] sm:$0xff] %v1249_v54  ;;  %v1262_v24 = vmul.f32 %v3358_v13, %v3533_v18  ;;  %v3551_v26 = vld [vmem:[%s4131_s6] ss:$0 sm:$0xff]  ;;  %v1263_v28 = vmul.f32 %v3358_v13, %v3546_v25  ;;  %v485_v34 = vld [vmem:[#allocation6 + $0x60] sm:$0xff] }
  0x85   : > { %1282 = vst [vmem:[%s3388_s30 + $0x90] sm:$0xff] %v1250_v55  ;;  %1283 = vst [vmem:[%s3388_s30 + $0x98] sm:$0xff] %v1251_v60  ;;  %v1303_v32 = vmul.f32 %v3551_v26, %v3356_v12  ;;  %v1305_v33 = vmul.f32 %v3551_v26, %v3367_v16  ;;  %v486_v35 = vld [vmem:[#allocation6 + $0x68] sm:$0xff]  ;;  %v1304_v39 = vmul.f32 %v3551_v26, %v3364_v15  ;;  %v487_v40 = vld [vmem:[#allocation6 + $0x70] sm:$0xff] }
  0x86   : > { %1284 = vst [vmem:[%s3388_s30 + $0xa0] sm:$0xff] %v1252_v61  ;;  %1285 = vst [vmem:[%s3388_s30 + $0xa8] sm:$0xff] %v1253_v62  ;;  %v1306_v13 = vmul.f32 %v3551_v26, %v3370_v17  ;;  %2446 = vmatpush3.bf16.msra.mxu0 %v2443_v59  ;;  %v2451_v12 = vpack.c.bf16 %v486_v35, %v485_v34  ;;  %v488_v41 = vld [vmem:[#allocation6 + $0x78] sm:$0xff]  ;;  %v721_v45 = vld [vmem:[#allocation8] sm:$0xff]  ;;  %v1307_v47 = vmul.f32 %v3551_v26, %v3379_v21 }
  0x87   : > { %1286 = vst [vmem:[%s3388_s30 + $0xb0] sm:$0xff] %v1254_v2  ;;  %1287 = vst [vmem:[%s3388_s30 + $0xb8] sm:$0xff] %v1255_v3  ;;  %1335 = vadd.xlane.f32.xlu0 %v1303_v32  ;;  %1339 = vadd.xlane.f32.xlu1 %v1305_v33  ;;  %v722_v46 = vld [vmem:[#allocation8 + $0x8] sm:$0xff]  ;;  %v1308_v51 = vmul.f32 %v3551_v26, %v3382_v22  ;;  %v723_v52 = vld [vmem:[#allocation8 + $0x10] sm:$0xff]  ;;  %v2455_v54 = vpack.c.bf16 %v488_v41, %v487_v40 }
  0x88   : > { %1288 = vst [vmem:[%s3388_s30 + $0xc0] sm:$0xff] %v1256_v4  ;;  %1289 = vst [vmem:[%s3388_s30 + $0xc8] sm:$0xff] %v1257_v8  ;;  %2448 = vmatprep.subr.bf16.mxu0 %v2447_v27  ;;  %v724_v53 = vld [vmem:[#allocation8 + $0x18] sm:$0xff]  ;;  %v2459_v55 = vpack.c.bf16 %v722_v46, %v721_v45  ;;  %v1309_v60 = vmul.f32 %v3551_v26, %v3385_v23  ;;  %v1310_v61 = vmul.f32 %v3551_v26, %v3398_v29  ;;  %v725_v62 = vld [vmem:[#allocation8 + $0x20] sm:$0xff] }
  0x89   : > { %1290 = vst [vmem:[%s3388_s30 + $0xd0] sm:$0xff] %v1258_v9  ;;  %1291 = vst [vmem:[%s3388_s30 + $0xd8] sm:$0xff] %v1259_v10  ;;  %v2463_v59 = vpack.c.bf16 %v724_v53, %v723_v52  ;;  %v726_v2 = vld [vmem:[#allocation8 + $0x28] sm:$0xff]  ;;  %v1311_v4 = vmul.f32 %v3551_v26, %v3401_v30  ;;  %v727_v8 = vld [vmem:[#allocation8 + $0x30] sm:$0xff]  ;;  %v1312_v10 = vmul.f32 %v3551_v26, %v3404_v31 }
  0x8a   : > { %1292 = vst [vmem:[%s3388_s30 + $0xe0] sm:$0xff] %v1260_v19  ;;  %1293 = vst [vmem:[%s3388_s30 + $0xe8] sm:$0xff] %v1261_v20  ;;  %2450 = vmatpush3.bf16.msra.mxu0 %v2447_v27  ;;  %2460 = vmatprep.subr.bf16.mxu1 %v2459_v55  ;;  %v2467_v3 = vpack.c.bf16 %v726_v2, %v725_v62  ;;  %v728_v9 = vld [vmem:[#allocation8 + $0x38] sm:$0xff]  ;;  %v1313_v20 = vmul.f32 %v3551_v26, %v3418_v36  ;;  %v730_v27 = vld [vmem:[#allocation8 + $0x48] sm:$0xff] }
  0x8b   : > { %1294 = vst [vmem:[%s3388_s30 + $0xf0] sm:$0xff] %v1262_v24  ;;  %1295 = vst [vmem:[%s3388_s30 + $0xf8] sm:$0xff] %v1263_v28  ;;  %1337 = vadd.xlane.f32.xlu0 %v1304_v39  ;;  %1341 = vadd.xlane.f32.xlu1 %v1306_v13  ;;  %v2471_v19 = vpack.c.bf16 %v728_v9, %v727_v8  ;;  %v729_v24 = vld [vmem:[#allocation8 + $0x40] sm:$0xff]  ;;  %v1314_v28 = vmul.f32 %v3551_v26, %v3421_v37  ;;  %v731_v33 = vld [vmem:[#allocation8 + $0x50] sm:$0xff] }
  0x8c   : > { %2452 = vmatprep.subr.bf16.mxu0 %v2451_v12  ;;  %2462 = vmatpush3.bf16.msra.mxu1 %v2459_v55  ;;  %v2475_v32 = vpack.c.bf16 %v730_v27, %v729_v24  ;;  %v732_v34 = vld [vmem:[#allocation8 + $0x58] sm:$0xff]  ;;  %v733_v39 = vld [vmem:[#allocation8 + $0x60] sm:$0xff]  ;;  %v734_v13 = vld [vmem:[#allocation8 + $0x68] sm:$0xff]  ;;  %v1320_v40 = vmul.f32 %v3551_v26, %v3457_v49 }
  0x8d   : > { %2464 = vmatprep.subr.bf16.mxu1 %v2463_v59  ;;  %v2479_v35 = vpack.c.bf16 %v732_v34, %v731_v33 }
  0x8e   : > { %2454 = vmatpush3.bf16.msra.mxu0 %v2451_v12  ;;  %v2483_v12 = vpack.c.bf16 %v734_v13, %v733_v39 }
  0x8f   : > { %1343 = vadd.xlane.f32.xlu0 %v1307_v47  ;;  %1345 = vadd.xlane.f32.xlu1 %v1308_v51 }
  0x90   : > { %2456 = vmatprep.subr.bf16.mxu0 %v2455_v54  ;;  %2466 = vmatpush3.bf16.msra.mxu1 %v2463_v59 }
  0x91   : > { %2468 = vmatprep.subr.bf16.mxu1 %v2467_v3 }
  0x92   : > { %2458 = vmatpush3.bf16.msra.mxu0 %v2455_v54 }
  0x93   : > { %1347 = vadd.xlane.f32.xlu0 %v1309_v60  ;;  %1349 = vadd.xlane.f32.xlu1 %v1310_v61 }
  0x94   : > { %2470 = vmatpush3.bf16.msra.mxu1 %v2467_v3 }
  0x95   : > { %2300 = vmatmul.mubr.f32.vlgmr.msra.gmra.mrb[0].mxu0 %v3364_v15  ;;  %2472 = vmatprep.subr.bf16.mxu1 %v2471_v19  ;;  %v1315_v15 = vmul.f32 %v3551_v26, %v3424_v38 }
  0x96   : > { %2302 = vmatprep.mubr.f32.mxu0 %v3367_v16  ;;  %v1316_v16 = vmul.f32 %v3551_v26, %v3436_v42 }
  0x97   : > { %1351 = vadd.xlane.f32.xlu0 %v1311_v4  ;;  %1353 = vadd.xlane.f32.xlu1 %v1312_v10 }
  0x98   : > { %2474 = vmatpush3.bf16.msra.mxu1 %v2471_v19 }
  0x99   : > { %2303 = vmatmul.mubr.f32.gmra.mrb[2].mxu0 %v3370_v17  ;;  %2476 = vmatprep.subr.bf16.mxu1 %v2475_v32  ;;  %v1317_v17 = vmul.f32 %v3551_v26, %v3439_v43 }
  0x9a   : > { %2305 = vmatprep.mubr.f32.mxu0 %v3379_v21  ;;  %v1318_v21 = vmul.f32 %v3551_v26, %v3442_v44 }
  0x9b   : > { %1355 = vadd.xlane.f32.xlu0 %v1313_v20  ;;  %1357 = vadd.xlane.f32.xlu1 %v1314_v28 }
  0x9c   : > { %2478 = vmatpush3.bf16.msra.mxu1 %v2475_v32 }
  0x9d   : > { %2306 = vmatmul.mubr.f32.gmra.mrb[4].mxu0 %v3382_v22  ;;  %2480 = vmatprep.subr.bf16.mxu1 %v2479_v35  ;;  %v1319_v22 = vmul.f32 %v3551_v26, %v3454_v48 }
  0x9e   : > { %2308 = vmatprep.mubr.f32.mxu0 %v3385_v23  ;;  %v1321_v23 = vmul.f32 %v3551_v26, %v3460_v50 }
  0x9f   : > { %1359 = vadd.xlane.f32.xlu0 %v1315_v15  ;;  %1361 = vadd.xlane.f32.xlu1 %v1316_v16 }
  0xa0   : > { %2482 = vmatpush3.bf16.msra.mxu1 %v2479_v35 }
  0xa1   : > { %2309 = vmatmul.mubr.f32.gmra.mrb[6].mxu0 %v3398_v29  ;;  %2484 = vmatprep.subr.bf16.mxu1 %v2483_v12  ;;  %v1322_v29 = vmul.f32 %v3551_v26, %v3472_v56 }
  0xa2   : > { %2311 = vmatprep.mubr.f32.mxu0 %v3401_v30  ;;  %v1323_v30 = vmul.f32 %v3551_v26, %v3475_v57 }
  0xa3   : > { %1363 = vadd.xlane.f32.xlu0 %v1317_v17  ;;  %1365 = vadd.xlane.f32.xlu1 %v1318_v21 }
  0xa4   : > { %2486 = vmatpush3.bf16.msra.mxu1 %v2483_v12 }
  0xa5   : > { %2312 = vmatmul.mubr.f32.gmra.mrb[8].mxu0 %v3404_v31  ;;  %v1324_v31 = vmul.f32 %v3551_v26, %v3478_v58 }
  0xa6   : > { %2314 = vmatprep.mubr.f32.mxu0 %v3418_v36  ;;  %v1325_v36 = vmul.f32 %v3551_v26, %v3491_v63 }
  0xa7   : > { %1367 = vadd.xlane.f32.xlu0 %v1319_v22  ;;  %1369 = vadd.xlane.f32.xlu1 %v1320_v40 }
  0xa9   : > { %2315 = vmatmul.mubr.f32.gmra.mrb[10].mxu0 %v3421_v37  ;;  %v1326_v37 = vmul.f32 %v3551_v26, %v3494_v0 }
  0xaa   : > { %2317 = vmatprep.mubr.f32.mxu0 %v3424_v38  ;;  %v1327_v38 = vmul.f32 %v3551_v26, %v3497_v1 }
  0xab   : > { %1371 = vadd.xlane.f32.xlu0 %v1321_v23  ;;  %1373 = vadd.xlane.f32.xlu1 %v1322_v29 }
  0xad   : > { %2318 = vmatmul.mubr.f32.gmra.mrb[12].mxu0 %v3436_v42  ;;  %v1328_v42 = vmul.f32 %v3551_v26, %v3509_v5 }
  0xae   : > { %2320 = vmatprep.mubr.f32.mxu0 %v3439_v43  ;;  %v1329_v43 = vmul.f32 %v3551_v26, %v3512_v6 }
  0xaf   : > { %1375 = vadd.xlane.f32.xlu0 %v1323_v30  ;;  %1377 = vadd.xlane.f32.xlu1 %v1324_v31 }
  0xb1   : > { %2321 = vmatmul.mubr.f32.gmra.mrb[14].mxu0 %v3442_v44  ;;  %v1330_v44 = vmul.f32 %v3551_v26, %v3515_v7 }
  0xb2   : > { %2323 = vmatprep.mubr.f32.mxu0 %v3454_v48  ;;  %v1331_v48 = vmul.f32 %v3551_v26, %v3527_v11 }
  0xb3   : > { %1379 = vadd.xlane.f32.xlu0 %v1325_v36  ;;  %1381 = vadd.xlane.f32.xlu1 %v1326_v37 }
  0xb5   : > { %2324 = vmatmul.mubr.f32.gmra.mrb[16].mxu0 %v3457_v49  ;;  %v1332_v49 = vmul.f32 %v3551_v26, %v3530_v14 }
  0xb6   : > { %2326 = vmatprep.mubr.f32.mxu0 %v3460_v50  ;;  %v1333_v50 = vmul.f32 %v3551_v26, %v3533_v18 }
  0xb7   : > { %1383 = vadd.xlane.f32.xlu0 %v1327_v38  ;;  %1385 = vadd.xlane.f32.xlu1 %v1328_v42 }
  0xb9   : > { %2327 = vmatmul.mubr.f32.gmra.mrb[18].mxu0 %v3472_v56  ;;  %v1334_v56 = vmul.f32 %v3551_v26, %v3546_v25 }
  0xba   : > { %2329 = vmatprep.mubr.f32.mxu0 %v3475_v57  ;;  %v735_v57 = vld [vmem:[#allocation8 + $0x70] sm:$0xff] }
  0xbb   : > { %1387 = vadd.xlane.f32.xlu0 %v1329_v43  ;;  %1389 = vadd.xlane.f32.xlu1 %v1330_v44 }
  0xbd   : > { %2330 = vmatmul.mubr.f32.gmra.mrb[20].mxu0 %v3478_v58  ;;  %v736_v58 = vld [vmem:[#allocation8 + $0x78] sm:$0xff] }
  0xbe   : > { %2332 = vmatprep.mubr.f32.mxu0 %v3491_v63  ;;  %v2487_v63 = vpack.c.bf16 %v736_v58, %v735_v57 }
  0xbf   : > { %1391 = vadd.xlane.f32.xlu0 %v1331_v48  ;;  %1393 = vadd.xlane.f32.xlu1 %v1332_v49 }
  0xc0   : > { %2488 = vmatprep.subr.bf16.mxu1 %v2487_v63 }
  0xc1   : > { %2333 = vmatmul.mubr.f32.gmra.mrb[22].mxu0 %v3494_v0  ;;  %2490 = vmatpush3.bf16.msra.mxu1 %v2487_v63  ;;  %v3086_v0 = vmov 0  }
  0xc2   : > { %2335 = vmatprep.mubr.f32.mxu0 %v3497_v1  ;;  %2574 = vset.pattern.permute.xlu1 %v3086_v0  ;;  %v3657_v1 = vld [vmem:[#allocation2] ss:$0 sm:$0xff] }
  0xc3   : > { %1395 = vadd.xlane.f32.xlu0 %v1333_v50  ;;  %1397 = vadd.xlane.f32.xlu1 %v1334_v56 }
  0xc4   : > { %2573 = vset.pattern.permute.xlu0 %v3086_v0 }
  0xc5   : > { %2336 = vmatmul.mubr.f32.gmra.mrb[24].mxu0 %v3509_v5 }
  0xc6   : > { %2338 = vmatprep.mubr.f32.mxu0 %v3512_v6 }
  0xc9   : > { %2339 = vmatmul.mubr.f32.gmra.mrb[26].mxu0 %v3515_v7 }
  0xca   : > { %2341 = vmatprep.mubr.f32.mxu0 %v3527_v11 }
  0xcd   : > { %2342 = vmatmul.mubr.f32.gmra.mrb[28].mxu0 %v3530_v14 }
  0xce   : > { %2344 = vmatprep.mubr.f32.mxu0 %v3533_v18 }
  0xd1   : > { %2345 = vmatmul.mubr.f32.gmra.mrb[30].mxu0 %v3546_v25 }
 0x114   : > { %v1336_v5 = vpop.xlane.xlu0 %1335  ;;  %v1340_v6 = vpop.xlane.xlu1 %1339 }
 0x115   : > { %v1406_v7 = vadd.f32 %v3657_v1, %v1336_v5  ;;  %v1408_v11 = vadd.f32 %v3657_v1, %v1340_v6 }
 0x117   : > { %v2124_v14 = vmul.f32 -1.442695, %v1406_v7  ;;  %v2126_v18 = vmul.f32 -1.442695, %v1408_v11 }
 0x118   : > { %v1338_v26 = vpop.xlane.xlu0 %1337  ;;  %v1342_v25 = vpop.xlane.xlu1 %1341 }
 0x119   : > { %2575 = vpow2.f32 %v2124_v14  ;;  %v1407_v41 = vadd.f32 %v3657_v1, %v1338_v26  ;;  %v1409_v45 = vadd.f32 %v3657_v1, %v1342_v25 }
 0x11a   : > { %2577 = vpow2.f32 %v2126_v18 }
 0x11b   : > { %v2125_v46 = vmul.f32 -1.442695, %v1407_v41  ;;  %v2127_v47 = vmul.f32 -1.442695, %v1409_v45 }
 0x11c   : > { %v1344_v51 = vpop.xlane.xlu0 %1343  ;;  %v1346_v52 = vpop.xlane.xlu1 %1345 }
 0x11d   : > { %2579 = vpow2.f32 %v2125_v46  ;;  %v1410_v53 = vadd.f32 %v3657_v1, %v1344_v51  ;;  %v1411_v54 = vadd.f32 %v3657_v1, %v1346_v52 }
 0x11e   : > { %2581 = vpow2.f32 %v2127_v47 }
 0x11f   : > { %v2128_v55 = vmul.f32 -1.442695, %v1410_v53  ;;  %v2129_v61 = vmul.f32 -1.442695, %v1411_v54 }
 0x120   : > { %v1348_v59 = vpop.xlane.xlu0 %1347  ;;  %v1350_v60 = vpop.xlane.xlu1 %1349 }
 0x121   : > { %v1412_v62 = vadd.f32 %v3657_v1, %v1348_v59  ;;  %2583 = vpow2.f32 %v2128_v55  ;;  %v1413_v3 = vadd.f32 %v3657_v1, %v1350_v60 }
 0x122   : > { %2585 = vpow2.f32 %v2129_v61 }
 0x123   : > { %v2576_v2 = vpop.eup %2575  ;;  %v2130_v9 = vmul.f32 -1.442695, %v1412_v62  ;;  %v2131_v32 = vmul.f32 -1.442695, %v1413_v3 }
 0x124   : > { %v2578_v4 = vpop.eup %2577  ;;  %v1534_v8 = vadd.f32 1.0, %v2576_v2  ;;  %v1352_v10 = vpop.xlane.xlu0 %1351 }
 0x125   : > { %v1536_v19 = vadd.f32 1.0, %v2578_v4  ;;  %v1354_v20 = vpop.xlane.xlu1 %1353  ;;  %v1414_v24 = vadd.f32 %v3657_v1, %v1352_v10 }
 0x126   : > { %2587 = vrcp.f32 %v1534_v8  ;;  %v1415_v27 = vadd.f32 %v3657_v1, %v1354_v20 }
 0x127   : > { %v2580_v28 = vpop.eup %2579  ;;  %2589 = vpow2.f32 %v2130_v9  ;;  %v2132_v17 = vmul.f32 -1.442695, %v1414_v24 }
 0x128   : > { %v2582_v15 = vpop.eup %2581  ;;  %v1535_v33 = vadd.f32 1.0, %v2580_v28  ;;  %v1356_v34 = vpop.xlane.xlu0 %1355  ;;  %v2133_v16 = vmul.f32 -1.442695, %v1415_v27  ;;  %2591 = vrcp.f32 %v1536_v19 }
 0x129   : > { %v1358_v35 = vpop.xlane.xlu1 %1357  ;;  %v1416_v39 = vadd.f32 %v3657_v1, %v1356_v34  ;;  %v1537_v21 = vadd.f32 1.0, %v2582_v15 }
 0x12a   : > { %2593 = vrcp.f32 %v1535_v33  ;;  %v1417_v13 = vadd.f32 %v3657_v1, %v1358_v35 }
 0x12b   : > { %2595 = vpow2.f32 %v2131_v32  ;;  %v2584_v40 = vpop.eup %2583  ;;  %v2134_v30 = vmul.f32 -1.442695, %v1416_v39 }
 0x12c   : > { %v1360_v12 = vpop.xlane.xlu0 %1359  ;;  %2597 = vpow2.f32 %v2133_v16  ;;  %v2135_v22 = vmul.f32 -1.442695, %v1417_v13  ;;  %v2586_v36 = vpop.eup %2585  ;;  %v1538_v38 = vadd.f32 1.0, %v2584_v40 }
 0x12d   : > { %v1418_v23 = vadd.f32 %v3657_v1, %v1360_v12  ;;  %v1362_v29 = vpop.xlane.xlu1 %1361  ;;  %2599 = vpow2.f32 %v2132_v17  ;;  %v1539_v58 = vadd.f32 1.0, %v2586_v36 }
 0x12e   : > { %v1419_v31 = vadd.f32 %v3657_v1, %v1362_v29  ;;  %2601 = vrcp.f32 %v1537_v21 }
 0x12f   : > { %2603 = vpow2.f32 %v2135_v22  ;;  %v2136_v44 = vmul.f32 -1.442695, %v1418_v23 }
 0x130   : > { %v2588_v37 = vpop.eup %2587  ;;  %v1364_v42 = vpop.xlane.xlu0 %1363  ;;  %v2137_v43 = vmul.f32 -1.442695, %v1419_v31  ;;  %2605 = vpow2.f32 %v2134_v30 }
 0x131   : > { %v1420_v48 = vadd.f32 %v3657_v1, %v1364_v42  ;;  %v1366_v49 = vpop.xlane.xlu1 %1365  ;;  %1632 = vperm.xlu0 %2573, %v2588_v37   ;;  %v2590_v50 = vpop.eup %2589 }
 0x132   : > { %v1421_v56 = vadd.f32 %v3657_v1, %v1366_v49  ;;  %v2592_v57 = vpop.eup %2591  ;;  %2607 = vpow2.f32 %v2137_v43  ;;  %v1540_v18 = vadd.f32 1.0, %v2590_v50 }
 0x133   : > { %2609 = vrcp.f32 %v1538_v38  ;;  %v2138_v7 = vmul.f32 -1.442695, %v1420_v48 }
 0x134   : > { %v2594_v63 = vpop.eup %2593  ;;  %v1368_v0 = vpop.xlane.xlu0 %1367  ;;  %v2139_v5 = vmul.f32 -1.442695, %v1421_v56  ;;  %2611 = vpow2.f32 %v2136_v44 }
 0x135   : > { %v2596_v6 = vpop.eup %2595  ;;  %1637 = vperm.xlu1 %2574, %v2594_v63   ;;  %v1370_v11 = vpop.xlane.xlu1 %1369  ;;  %v1422_v26 = vadd.f32 %v3657_v1, %v1368_v0  ;;  %2613 = vrcp.f32 %v1539_v58 }
 0x136   : > { %v2598_v14 = vpop.eup %2597  ;;  %v1423_v25 = vadd.f32 %v3657_v1, %v1370_v11  ;;  %2615 = vpow2.f32 %v2139_v5  ;;  %v1541_v52 = vadd.f32 1.0, %v2596_v6 }
 0x137   : > { %v1543_v41 = vadd.f32 1.0, %v2598_v14  ;;  %v2600_v45 = vpop.eup %2599  ;;  %2617 = vpow2.f32 %v2138_v7  ;;  %v2140_v55 = vmul.f32 -1.442695, %v1422_v26 }
 0x138   : > { %v1372_v46 = vpop.xlane.xlu0 %1371  ;;  %v2141_v47 = vmul.f32 -1.442695, %v1423_v25  ;;  %v2602_v51 = vpop.eup %2601  ;;  %2619 = vrcp.f32 %v1540_v18  ;;  %v1542_v62 = vadd.f32 1.0, %v2600_v45 }
 0x139   : > { %1642 = vperm.xlu1 %2574, %v2592_v57   ;;  %v1374_v53 = vpop.xlane.xlu1 %1373  ;;  %v2604_v54 = vpop.eup %2603  ;;  %2621 = vrcp.f32 %v1543_v41  ;;  %v1424_v2 = vadd.f32 %v3657_v1, %v1372_v46 }
 0x13a   : > { %v1425_v59 = vadd.f32 %v3657_v1, %v1374_v53  ;;  %v1545_v60 = vadd.f32 1.0, %v2604_v54  ;;  %v2606_v61 = vpop.eup %2605  ;;  %2623 = vpow2.f32 %v2141_v47 }
 0x13b   : > { %2625 = vrcp.f32 %v1541_v52  ;;  %v2142_v27 = vmul.f32 -1.442695, %v1424_v2  ;;  %v1544_v33 = vadd.f32 1.0, %v2606_v61 }
 0x13c   : > { %v1376_v3 = vpop.xlane.xlu0 %1375  ;;  %v2608_v4 = vpop.eup %2607  ;;  %2627 = vpow2.f32 %v2140_v55  ;;  %v2143_v19 = vmul.f32 -1.442695, %v1425_v59 }
 0x13d   : > { %1647 = vperm.xlu1 %2574, %v2602_v51   ;;  %v1378_v8 = vpop.xlane.xlu1 %1377  ;;  %v2610_v9 = vpop.eup %2609  ;;  %v1547_v10 = vadd.f32 1.0, %v2608_v4  ;;  %2629 = vrcp.f32 %v1545_v60  ;;  %v1426_v34 = vadd.f32 %v3657_v1, %v1376_v3 }
 0x13e   : > { %v1427_v20 = vadd.f32 %v3657_v1, %v1378_v8  ;;  %v2612_v24 = vpop.eup %2611  ;;  %2631 = vrcp.f32 %v1542_v62 }
 0x13f   : > { %v2614_v15 = vpop.eup %2613  ;;  %2633 = vrcp.f32 %v1547_v10  ;;  %v1546_v17 = vadd.f32 1.0, %v2612_v24  ;;  %v2144_v29 = vmul.f32 -1.442695, %v1426_v34 }
 0x140   : > { %v1380_v28 = vpop.xlane.xlu0 %1379  ;;  %v2145_v32 = vmul.f32 -1.442695, %v1427_v20  ;;  %v2616_v35 = vpop.eup %2615  ;;  %2635 = vpow2.f32 %v2143_v19 }
 0x141   : > { %1652 = vperm.xlu1 %2574, %v2610_v9   ;;  %v1382_v16 = vpop.xlane.xlu1 %1381  ;;  %v2618_v13 = vpop.eup %2617  ;;  %v1549_v21 = vadd.f32 1.0, %v2616_v35  ;;  %v1428_v30 = vadd.f32 %v3657_v1, %v1380_v28 }
 0x142   : > { %v1429_v39 = vadd.f32 %v3657_v1, %v1382_v16  ;;  %2637 = vpow2.f32 %v2145_v32  ;;  %v2620_v12 = vpop.eup %2619  ;;  %v1548_v37 = vadd.f32 1.0, %v2618_v13 }
 0x143   : > { %2639 = vpow2.f32 %v2142_v27  ;;  %v2622_v23 = vpop.eup %2621  ;;  %v2146_v56 = vmul.f32 -1.442695, %v1428_v30 }
 0x144   : > { %v1384_v22 = vpop.xlane.xlu0 %1383  ;;  %v2147_v40 = vmul.f32 -1.442695, %v1429_v39  ;;  %2641 = vrcp.f32 %v1544_v33  ;;  %v2624_v36 = vpop.eup %2623  ;;  %1677 = vperm.xlu0 %2573, %v2622_v23  }
 0x145   : > { %1657 = vperm.xlu1 %2574, %v2614_v15   ;;  %v1386_v31 = vpop.xlane.xlu1 %1385  ;;  %2643 = vrcp.f32 %v1546_v17  ;;  %v2626_v42 = vpop.eup %2625  ;;  %v1551_v43 = vadd.f32 1.0, %v2624_v36  ;;  %v1430_v63 = vadd.f32 %v3657_v1, %v1384_v22 }
 0x146   : > { %v1431_v38 = vadd.f32 %v3657_v1, %v1386_v31  ;;  %2645 = vrcp.f32 %v1549_v21  ;;  %v2628_v44 = vpop.eup %2627 }
 0x147   : > { %2647 = vpow2.f32 %v2147_v40  ;;  %v2630_v50 = vpop.eup %2629  ;;  %v1550_v7 = vadd.f32 1.0, %v2628_v44  ;;  %v2148_v25 = vmul.f32 -1.442695, %v1430_v63 }
 0x148   : > { %v1388_v48 = vpop.xlane.xlu0 %1387  ;;  %v2149_v49 = vmul.f32 -1.442695, %v1431_v38  ;;  %2649 = vpow2.f32 %v2144_v29  ;;  %v2632_v58 = vpop.eup %2631  ;;  %1687 = vperm.xlu0 %2573, %v2630_v50   ;;  %v3694_v50 = vld [vmem:[%s4128_s3] ss:$0 sm:$0xff] }
 0x149   : > { %1662 = vperm.xlu1 %2574, %v2620_v12   ;;  %v1390_v57 = vpop.xlane.xlu1 %1389  ;;  %2651 = vrcp.f32 %v1548_v37  ;;  %v2634_v0 = vpop.eup %2633  ;;  %v1432_v41 = vadd.f32 %v3657_v1, %v1388_v48 }
 0x14a   : > { %2653 = vrcp.f32 %v1551_v43  ;;  %v1433_v5 = vadd.f32 %v3657_v1, %v1390_v57  ;;  %v2636_v6 = vpop.eup %2635 }
 0x14b   : > { %2655 = vpow2.f32 %v2149_v49  ;;  %v1553_v14 = vadd.f32 1.0, %v2636_v6  ;;  %v2150_v62 = vmul.f32 -1.442695, %v1432_v41 }
 0x14c   : > { %v2638_v11 = vpop.eup %2637  ;;  %2657 = vpow2.f32 %v2146_v56  ;;  %v1392_v45 = vpop.xlane.xlu0 %1391  ;;  %1697 = vperm.xlu0 %2573, %v2634_v0   ;;  %v2151_v52 = vmul.f32 -1.442695, %v1433_v5 }
 0x14d   : > { %1667 = vperm.xlu1 %2574, %v2626_v42   ;;  %v1394_v18 = vpop.xlane.xlu1 %1393  ;;  %v2640_v26 = vpop.eup %2639  ;;  %v1555_v46 = vadd.f32 1.0, %v2638_v11  ;;  %2659 = vrcp.f32 %v1553_v14  ;;  %v1434_v4 = vadd.f32 %v3657_v1, %v1392_v45 }
 0x14e   : > { %v1435_v47 = vadd.f32 %v3657_v1, %v1394_v18  ;;  %v2642_v51 = vpop.eup %2641  ;;  %2661 = vrcp.f32 %v1550_v7  ;;  %v1552_v59 = vadd.f32 1.0, %v2640_v26 }
 0x14f   : > { %v2644_v53 = vpop.eup %2643  ;;  %2663 = vrcp.f32 %v1555_v46  ;;  %v2152_v28 = vmul.f32 -1.442695, %v1434_v4 }
 0x150   : > { %v2153_v54 = vmul.f32 -1.442695, %v1435_v47  ;;  %v2646_v55 = vpop.eup %2645  ;;  %2665 = vpow2.f32 %v2148_v25  ;;  %v1396_v10 = vpop.xlane.xlu0 %1395 }
 0x151   : > { %1672 = vperm.xlu1 %2574, %v2632_v58   ;;  %v1398_v60 = vpop.xlane.xlu1 %1397  ;;  %v2648_v61 = vpop.eup %2647  ;;  %1707 = vperm.xlu0 %2573, %v2646_v55   ;;  %2667 = vpow2.f32 %v2151_v52  ;;  %v1436_v32 = vadd.f32 %v3657_v1, %v1396_v10 }
 0x152   : > { %v1437_v2 = vadd.f32 %v3657_v1, %v1398_v60  ;;  %v2650_v3 = vpop.eup %2649  ;;  %v1557_v8 = vadd.f32 1.0, %v2648_v61  ;;  %2669 = vpow2.f32 %v2153_v54 }
 0x153   : > { %v2652_v9 = vpop.eup %2651  ;;  %2671 = vrcp.f32 %v1552_v59  ;;  %v1554_v33 = vadd.f32 1.0, %v2650_v3  ;;  %v2154_v39 = vmul.f32 -1.442695, %v1436_v32 }
 0x154   : > { %v2155_v19 = vmul.f32 -1.442695, %v1437_v2  ;;  %v2654_v20 = vpop.eup %2653  ;;  %2673 = vpow2.f32 %v2150_v62 }
 0x155   : > { %1682 = vperm.xlu1 %2574, %v2642_v51   ;;  %v2656_v24 = vpop.eup %2655  ;;  %1717 = vperm.xlu0 %2573, %v2654_v20   ;;  %2675 = vrcp.f32 %v1557_v8 }
 0x156   : > { %v2658_v27 = vpop.eup %2657  ;;  %v1559_v15 = vadd.f32 1.0, %v2656_v24  ;;  %2677 = vpow2.f32 %v2155_v19 }
 0x157   : > { %v2660_v34 = vpop.eup %2659  ;;  %v1556_v35 = vadd.f32 1.0, %v2658_v27 }
 0x158   : > { %2679 = vrcp.f32 %v1559_v15  ;;  %v2662_v16 = vpop.eup %2661 }
 0x159   : > { %1692 = vperm.xlu1 %2574, %v2644_v53   ;;  %1727 = vperm.xlu0 %2573, %v2660_v34   ;;  %v2664_v17 = vpop.eup %2663  ;;  %2681 = vpow2.f32 %v2152_v28 }
 0x15a   : > { %v2666_v13 = vpop.eup %2665  ;;  %2683 = vrcp.f32 %v1554_v33 }
 0x15b   : > { %v2668_v21 = vpop.eup %2667  ;;  %2685 = vrcp.f32 %v1556_v35  ;;  %v1558_v29 = vadd.f32 1.0, %v2666_v13 }
 0x15c   : > { %v2670_v12 = vpop.eup %2669  ;;  %v1561_v1 = vadd.f32 1.0, %v2668_v21  ;;  %2687 = vpow2.f32 %v2154_v39 }
 0x15d   : > { %1702 = vperm.xlu1 %2574, %v2652_v9   ;;  %1737 = vperm.xlu0 %2573, %v2664_v17   ;;  %v2672_v22 = vpop.eup %2671  ;;  %v1563_v40 = vadd.f32 1.0, %v2670_v12 }
 0x15e   : > { %v2674_v23 = vpop.eup %2673  ;;  %2689 = vrcp.f32 %v1561_v1 }
 0x15f   : > { %v2676_v30 = vpop.eup %2675  ;;  %2691 = vrcp.f32 %v1563_v40  ;;  %v1560_v38 = vadd.f32 1.0, %v2674_v23 }
 0x160   : > { %v2678_v31 = vpop.eup %2677  ;;  %2693 = vrcp.f32 %v1558_v29 }
 0x161   : > { %1712 = vperm.xlu1 %2574, %v2662_v16   ;;  %1747 = vperm.xlu0 %2573, %v2676_v30   ;;  %v1565_v37 = vadd.f32 1.0, %v2678_v31 }
 0x162   : > { %v2680_v36 = vpop.eup %2679 }
 0x163   : > { %v2682_v42 = vpop.eup %2681  ;;  %2695 = vrcp.f32 %v1565_v37 }
 0x164   : > { %v2684_v43 = vpop.eup %2683  ;;  %2697 = vrcp.f32 %v1560_v38  ;;  %v1562_v48 = vadd.f32 1.0, %v2682_v42 }
 0x165   : > { %1722 = vperm.xlu1 %2574, %v2672_v22   ;;  %1757 = vperm.xlu0 %2573, %v2680_v36   ;;  %v2686_v44 = vpop.eup %2685 }
 0x166   : > { %v2688_v49 = vpop.eup %2687  ;;  %2699 = vrcp.f32 %v1562_v48 }
 0x167   : > { %v1564_v5 = vadd.f32 1.0, %v2688_v49 }
 0x168   : > { %v2690_v56 = vpop.eup %2689  ;;  %v2301_v57 = vpop.f32.mrb[0].mxu0 }
 0x169   : > { %1732 = vperm.xlu1 %2574, %v2684_v43   ;;  %v562_v58 = vpop.f32.mrb[1].mxu0  ;;  %1767 = vperm.xlu0 %2573, %v2690_v56   ;;  %v2692_v63 = vpop.eup %2691  ;;  %v568_v6 = vadd.f32 %v2301_v57, %v3694_v50  ;;  %2701 = vrcp.f32 %v1564_v5 }
 0x16a   : > { %v563_v0 = vadd.f32 %v3694_v50, %v562_v58  ;;  %v2694_v7 = vpop.eup %2693 }
 0x16c   : > { %v2304_v11 = vpop.f32.mrb[2].mxu0  ;;  %2379 = vmatprep.mubr.f32.mxu1 %v563_v0 }
 0x16d   : > { %1742 = vperm.xlu1 %2574, %v2686_v44   ;;  %v572_v14 = vpop.f32.mrb[3].mxu0  ;;  %2380 = vmatmul.mubr.f32.vlgmr.msra.gmra.mrb[0].mxu1 %v568_v6  ;;  %v2696_v18 = vpop.eup %2695  ;;  %v578_v25 = vadd.f32 %v2304_v11, %v3694_v50 }
 0x16e   : > { %1777 = vperm.xlu0 %2573, %v2692_v63   ;;  %v573_v26 = vadd.f32 %v3694_v50, %v572_v14  ;;  %v2698_v41 = vpop.eup %2697 }
 0x170   : > { %v2307_v45 = vpop.f32.mrb[4].mxu0  ;;  %2382 = vmatprep.mubr.f32.mxu1 %v573_v26  ;;  %v2700_v52 = vpop.eup %2699 }
 0x171   : > { %1752 = vperm.xlu1 %2574, %v2694_v7   ;;  %v582_v46 = vpop.f32.mrb[5].mxu0  ;;  %2383 = vmatmul.mubr.f32.gmra.mrb[2].mxu1 %v578_v25  ;;  %v588_v51 = vadd.f32 %v2307_v45, %v3694_v50 }
 0x172   : > { %1787 = vperm.xlu0 %2573, %v2696_v18   ;;  %v583_v47 = vadd.f32 %v3694_v50, %v582_v46  ;;  %v3729_v18 = vld [vmem:[%s3340_s14] sm:$0xff]  ;;  %v3742_v46 = vld [vmem:[%s3340_s14 + $0x10] sm:$0xff] }
 0x173   : > { %v2702_v60 = vpop.eup %2701 }
 0x174   : > { %v2310_v53 = vpop.f32.mrb[6].mxu0  ;;  %2385 = vmatprep.mubr.f32.mxu1 %v583_v47 }
 0x175   : > { %1762 = vperm.xlu1 %2574, %v2698_v41   ;;  %v592_v54 = vpop.f32.mrb[7].mxu0  ;;  %2386 = vmatmul.mubr.f32.gmra.mrb[4].mxu1 %v588_v51  ;;  %v598_v59 = vadd.f32 %v2310_v53, %v3694_v50  ;;  %v3737_v41 = vld [vmem:[%s3340_s14 + $0x8] sm:$0xff] }
 0x176   : > { %v593_v55 = vadd.f32 %v3694_v50, %v592_v54 }
 0x178   : > { %v2313_v61 = vpop.f32.mrb[8].mxu0  ;;  %2388 = vmatprep.mubr.f32.mxu1 %v593_v55  ;;  %v3752_v55 = vld [vmem:[%s3340_s14 + $0x20] sm:$0xff] }
 0x179   : > { %1772 = vperm.xlu1 %2574, %v2700_v52   ;;  %v602_v62 = vpop.f32.mrb[9].mxu0  ;;  %2389 = vmatmul.mubr.f32.gmra.mrb[6].mxu1 %v598_v59  ;;  %v608_v3 = vadd.f32 %v2313_v61, %v3694_v50  ;;  %v3747_v52 = vld [vmem:[%s3340_s14 + $0x18] sm:$0xff]  ;;  %v3757_v61 = vld [vmem:[%s3340_s14 + $0x28] sm:$0xff] }
 0x17a   : > { %v603_v2 = vadd.f32 %v3694_v50, %v602_v62 }
 0x17c   : > { %v2316_v4 = vpop.f32.mrb[10].mxu0  ;;  %2391 = vmatprep.mubr.f32.mxu1 %v603_v2 }
 0x17d   : > { %1782 = vperm.xlu1 %2574, %v2702_v60   ;;  %v612_v8 = vpop.f32.mrb[11].mxu0  ;;  %2392 = vmatmul.mubr.f32.gmra.mrb[8].mxu1 %v608_v3  ;;  %v618_v10 = vadd.f32 %v2316_v4, %v3694_v50  ;;  %v3761_v3 = vld [vmem:[%s3340_s14 + $0x48] sm:$0xff] }
 0x17e   : > { %v613_v9 = vadd.f32 %v3694_v50, %v612_v8 }
 0x180   : > { %v2319_v19 = vpop.f32.mrb[12].mxu0  ;;  %2394 = vmatprep.mubr.f32.mxu1 %v613_v9  ;;  %v3767_v9 = vld [vmem:[%s3340_s14 + $0x30] sm:$0xff] }
 0x181   : > { %v622_v20 = vpop.f32.mrb[13].mxu0  ;;  %2395 = vmatmul.mubr.f32.gmra.mrb[10].mxu1 %v618_v10  ;;  %v628_v27 = vadd.f32 %v2319_v19, %v3694_v50 }
 0x182   : > { %v623_v24 = vadd.f32 %v3694_v50, %v622_v20 }
 0x184   : > { %v2322_v28 = vpop.f32.mrb[14].mxu0  ;;  %2397 = vmatprep.mubr.f32.mxu1 %v623_v24  ;;  %v3772_v24 = vld [vmem:[%s3340_s14 + $0x38] sm:$0xff] }
 0x185   : > { %v632_v32 = vpop.f32.mrb[15].mxu0  ;;  %2398 = vmatmul.mubr.f32.gmra.mrb[12].mxu1 %v628_v27  ;;  %v638_v33 = vadd.f32 %v2322_v28, %v3694_v50 }
 0x186   : > { %v633_v15 = vadd.f32 %v3694_v50, %v632_v32 }
 0x188   : > { %v2325_v34 = vpop.f32.mrb[16].mxu0  ;;  %2400 = vmatprep.mubr.f32.mxu1 %v633_v15  ;;  %v3777_v15 = vld [vmem:[%s3340_s14 + $0x40] sm:$0xff] }
 0x189   : > { %v642_v16 = vpop.f32.mrb[17].mxu0  ;;  %2401 = vmatmul.mubr.f32.gmra.mrb[14].mxu1 %v638_v33  ;;  %v648_v17 = vadd.f32 %v2325_v34, %v3694_v50 }
 0x18a   : > { %v643_v35 = vadd.f32 %v3694_v50, %v642_v16 }
 0x18c   : > { %v2328_v39 = vpop.f32.mrb[18].mxu0  ;;  %2403 = vmatprep.mubr.f32.mxu1 %v643_v35  ;;  %v3782_v35 = vld [vmem:[%s3340_s14 + $0x50] sm:$0xff] }
 0x18d   : > { %v652_v13 = vpop.f32.mrb[19].mxu0  ;;  %2404 = vmatmul.mubr.f32.gmra.mrb[16].mxu1 %v648_v17  ;;  %v658_v12 = vadd.f32 %v2328_v39, %v3694_v50 }
 0x18e   : > { %v653_v21 = vadd.f32 %v3694_v50, %v652_v13 }
 0x190   : > { %v2331_v1 = vpop.f32.mrb[20].mxu0  ;;  %2406 = vmatprep.mubr.f32.mxu1 %v653_v21  ;;  %v3787_v21 = vld [vmem:[%s3340_s14 + $0x60] sm:$0xff] }
 0x191   : > { %v662_v22 = vpop.f32.mrb[21].mxu0  ;;  %2407 = vmatmul.mubr.f32.gmra.mrb[18].mxu1 %v658_v12  ;;  %v668_v23 = vadd.f32 %v2331_v1, %v3694_v50 }
 0x192   : > { %v663_v40 = vadd.f32 %v3694_v50, %v662_v22 }
 0x194   : > { %v2334_v29 = vpop.f32.mrb[22].mxu0  ;;  %2409 = vmatprep.mubr.f32.mxu1 %v663_v40  ;;  %v3792_v40 = vld [vmem:[%s3340_s14 + $0x70] sm:$0xff] }
 0x195   : > { %v672_v30 = vpop.f32.mrb[23].mxu0  ;;  %2410 = vmatmul.mubr.f32.gmra.mrb[20].mxu1 %v668_v23  ;;  %v678_v36 = vadd.f32 %v2334_v29, %v3694_v50 }
 0x196   : > { %v673_v31 = vadd.f32 %v3694_v50, %v672_v30 }
 0x198   : > { %v2337_v37 = vpop.f32.mrb[24].mxu0  ;;  %2412 = vmatprep.mubr.f32.mxu1 %v673_v31  ;;  %v3797_v31 = vld [vmem:[%s3340_s14 + $0x80] sm:$0xff] }
 0x199   : > { %v682_v38 = vpop.f32.mrb[25].mxu0  ;;  %2413 = vmatmul.mubr.f32.gmra.mrb[22].mxu1 %v678_v36  ;;  %v688_v43 = vadd.f32 %v2337_v37, %v3694_v50  ;;  %v3801_v37 = vld [vmem:[%s3340_s14 + $0x58] sm:$0xff] }
 0x19a   : > { %v683_v42 = vadd.f32 %v3694_v50, %v682_v38 }
 0x19c   : > { %v2340_v44 = vpop.f32.mrb[26].mxu0  ;;  %2415 = vmatprep.mubr.f32.mxu1 %v683_v42 }
 0x19d   : > { %v692_v48 = vpop.f32.mrb[27].mxu0  ;;  %2416 = vmatmul.mubr.f32.gmra.mrb[24].mxu1 %v688_v43  ;;  %v698_v56 = vadd.f32 %v2340_v44, %v3694_v50  ;;  %v3807_v44 = vld [vmem:[%s3340_s14 + $0x90] sm:$0xff] }
 0x19e   : > { %v693_v49 = vadd.f32 %v3694_v50, %v692_v48 }
 0x1a0   : > { %v2343_v57 = vpop.f32.mrb[28].mxu0  ;;  %2418 = vmatprep.mubr.f32.mxu1 %v693_v49  ;;  %v3811_v49 = vld [vmem:[%s3340_s14 + $0x68] sm:$0xff] }
 0x1a1   : > { %v702_v58 = vpop.f32.mrb[29].mxu0  ;;  %2419 = vmatmul.mubr.f32.gmra.mrb[26].mxu1 %v698_v56  ;;  %v708_v0 = vadd.f32 %v2343_v57, %v3694_v50 }
 0x1a2   : > { %v703_v63 = vadd.f32 %v3694_v50, %v702_v58 }
 0x1a4   : > { %v2346_v5 = vpop.f32.mrb[30].mxu0  ;;  %2421 = vmatprep.mubr.f32.mxu1 %v703_v63  ;;  %v3817_v63 = vld [vmem:[%s3340_s14 + $0xa0] sm:$0xff] }
 0x1a5   : > { %v712_v6 = vpop.f32.mrb[31].mxu0  ;;  %2422 = vmatmul.mubr.f32.gmra.mrb[28].mxu1 %v708_v0  ;;  %v718_v11 = vadd.f32 %v2346_v5, %v3694_v50  ;;  %v3821_v5 = vld [vmem:[%s3340_s14 + $0x78] sm:$0xff] }
 0x1a6   : > { %v713_v7 = vadd.f32 %v3694_v50, %v712_v6 }
 0x1a8   : > { %2424 = vmatprep.mubr.f32.mxu1 %v713_v7 }
 0x1a9   : > { %2425 = vmatmul.mubr.f32.gmra.mrb[30].mxu1 %v718_v11 }
 0x1b0   : > { %v1633_v14 = vpop.permute.xlu0 %1632 }
 0x1b1   : > { %v1790_v26 = vmul.f32 %v3729_v18, %v1633_v14  ;;  %v3827_v14 = vld [vmem:[%s3340_s14 + $0x88] sm:$0xff] }
 0x1b3   : > { %1822 = vst [vmem:[%s3733_s29] sm:$0xff] %v1790_v26 }
 0x1b4   : > { %v1638_v25 = vpop.permute.xlu1 %1637 }
 0x1b5   : > { %v1791_v50 = vmul.f32 %v3737_v41, %v1638_v25  ;;  %v3831_v25 = vld [vmem:[%s3340_s14 + $0xb0] sm:$0xff] }
 0x1b7   : > { %1823 = vst [vmem:[%s3733_s29 + $0x8] sm:$0xff] %v1791_v50 }
 0x1b8   : > { %v1643_v45 = vpop.permute.xlu1 %1642 }
 0x1b9   : > { %v1792_v47 = vmul.f32 %v3742_v46, %v1643_v45  ;;  %v3836_v45 = vld [vmem:[%s3340_s14 + $0x98] sm:$0xff] }
 0x1bb   : > { %1824 = vst [vmem:[%s3733_s29 + $0x10] sm:$0xff] %v1792_v47 }
 0x1bc   : > { %v1648_v51 = vpop.permute.xlu1 %1647 }
 0x1bd   : > { %v1793_v53 = vmul.f32 %v3747_v52, %v1648_v51  ;;  %v3840_v51 = vld [vmem:[%s3340_s14 + $0xa8] sm:$0xff] }
 0x1bf   : > { %1825 = vst [vmem:[%s3733_s29 + $0x18] sm:$0xff] %v1793_v53 }
 0x1c0   : > { %v1653_v54 = vpop.permute.xlu1 %1652 }
 0x1c1   : > { %v1794_v59 = vmul.f32 %v3752_v55, %v1653_v54  ;;  %v3844_v54 = vld [vmem:[%s3340_s14 + $0xb8] sm:$0xff] }
 0x1c3   : > { %1826 = vst [vmem:[%s3733_s29 + $0x20] sm:$0xff] %v1794_v59  ;;  %v1678_v2 = vpop.permute.xlu0 %1677 }
 0x1c4   : > { %v1658_v60 = vpop.permute.xlu1 %1657  ;;  %v1799_v4 = vmul.f32 %v3761_v3, %v1678_v2 }
 0x1c5   : > { %v1795_v62 = vmul.f32 %v3757_v61, %v1658_v60  ;;  %v3848_v60 = vld [vmem:[%s3340_s14 + $0xc8] sm:$0xff] }
 0x1c6   : > { %1831 = vst [vmem:[%s3733_s29 + $0x48] sm:$0xff] %v1799_v4  ;;  %v3853_v4 = vld [vmem:[%s3340_s14 + $0xd8] sm:$0xff] }
 0x1c7   : > { %1827 = vst [vmem:[%s3733_s29 + $0x28] sm:$0xff] %v1795_v62  ;;  %v1688_v19 = vpop.permute.xlu0 %1687 }
 0x1c8   : > { %v1663_v8 = vpop.permute.xlu1 %1662  ;;  %v1801_v38 = vmul.f32 %v3801_v37, %v1688_v19 }
 0x1c9   : > { %v1796_v10 = vmul.f32 %v3767_v9, %v1663_v8 }
 0x1ca   : > { %1833 = vst [vmem:[%s3733_s29 + $0x58] sm:$0xff] %v1801_v38 }
 0x1cb   : > { %1828 = vst [vmem:[%s3733_s29 + $0x30] sm:$0xff] %v1796_v10  ;;  %v1698_v28 = vpop.permute.xlu0 %1697  ;;  %v3857_v10 = vld [vmem:[%s3340_s14 + $0xe8] sm:$0xff] }
 0x1cc   : > { %v1668_v20 = vpop.permute.xlu1 %1667  ;;  %v1803_v56 = vmul.f32 %v3811_v49, %v1698_v28 }
 0x1cd   : > { %v1797_v27 = vmul.f32 %v3772_v24, %v1668_v20 }
 0x1ce   : > { %1835 = vst [vmem:[%s3733_s29 + $0x68] sm:$0xff] %v1803_v56 }
 0x1cf   : > { %1829 = vst [vmem:[%s3733_s29 + $0x38] sm:$0xff] %v1797_v27  ;;  %v3865_v27 = vld [vmem:[%s3340_s14 + $0xc0] sm:$0xff] }
 0x1d0   : > { %v1673_v32 = vpop.permute.xlu1 %1672  ;;  %v1708_v34 = vpop.permute.xlu0 %1707 }
 0x1d1   : > { %v1798_v33 = vmul.f32 %v3777_v15, %v1673_v32  ;;  %v1805_v6 = vmul.f32 %v3821_v5, %v1708_v34 }
 0x1d3   : > { %1830 = vst [vmem:[%s3733_s29 + $0x40] sm:$0xff] %v1798_v33  ;;  %1837 = vst [vmem:[%s3733_s29 + $0x78] sm:$0xff] %v1805_v6  ;;  %v3872_v33 = vld [vmem:[%s3340_s14 + $0xf8] sm:$0xff] }
 0x1d4   : > { %v1683_v16 = vpop.permute.xlu1 %1682  ;;  %v1718_v39 = vpop.permute.xlu0 %1717 }
 0x1d5   : > { %v1800_v17 = vmul.f32 %v3782_v35, %v1683_v16  ;;  %v1807_v26 = vmul.f32 %v3827_v14, %v1718_v39 }
 0x1d7   : > { %1832 = vst [vmem:[%s3733_s29 + $0x50] sm:$0xff] %v1800_v17  ;;  %1839 = vst [vmem:[%s3733_s29 + $0x88] sm:$0xff] %v1807_v26  ;;  %v3876_v17 = vld [vmem:[%s3340_s14 + $0xd0] sm:$0xff] }
 0x1d8   : > { %v1693_v13 = vpop.permute.xlu1 %1692  ;;  %v1728_v1 = vpop.permute.xlu0 %1727 }
 0x1d9   : > { %v1802_v12 = vmul.f32 %v3787_v21, %v1693_v13  ;;  %v1809_v47 = vmul.f32 %v3836_v45, %v1728_v1 }
 0x1db   : > { %1834 = vst [vmem:[%s3733_s29 + $0x60] sm:$0xff] %v1802_v12  ;;  %1841 = vst [vmem:[%s3733_s29 + $0x98] sm:$0xff] %v1809_v47  ;;  %v3882_v12 = vld [vmem:[%s3340_s14 + $0xe0] sm:$0xff] }
 0x1dc   : > { %v1703_v22 = vpop.permute.xlu1 %1702  ;;  %v1738_v29 = vpop.permute.xlu0 %1737 }
 0x1dd   : > { %v1804_v23 = vmul.f32 %v3792_v40, %v1703_v22  ;;  %v1811_v53 = vmul.f32 %v3840_v51, %v1738_v29 }
 0x1df   : > { %1836 = vst [vmem:[%s3733_s29 + $0x70] sm:$0xff] %v1804_v23  ;;  %1843 = vst [vmem:[%s3733_s29 + $0xa8] sm:$0xff] %v1811_v53  ;;  %v3887_v23 = vld [vmem:[%s3340_s14 + $0xf0] sm:$0xff]  ;;  %s3904_s14 = scalar_lea.sflag [#allocation11], %s1859_s22 }
 0x1e0   : > { %v1713_v30 = vpop.permute.xlu1 %1712  ;;  %v1748_v42 = vpop.permute.xlu0 %1747 }
 0x1e1   : > { %v1806_v36 = vmul.f32 %v3797_v31, %v1713_v30  ;;  %v1813_v59 = vmul.f32 %v3844_v54, %v1748_v42 }
 0x1e3   : > { %1838 = vst [vmem:[%s3733_s29 + $0x80] sm:$0xff] %v1806_v36  ;;  %1845 = vst [vmem:[%s3733_s29 + $0xb8] sm:$0xff] %v1813_v59 }
 0x1e4   : > { %v1723_v43 = vpop.permute.xlu1 %1722  ;;  %v1758_v57 = vpop.permute.xlu0 %1757 }
 0x1e5   : > { %v1808_v48 = vmul.f32 %v3807_v44, %v1723_v43  ;;  %v1815_v62 = vmul.f32 %v3848_v60, %v1758_v57 }
 0x1e7   : > { %1840 = vst [vmem:[%s3733_s29 + $0x90] sm:$0xff] %v1808_v48  ;;  %1847 = vst [vmem:[%s3733_s29 + $0xc8] sm:$0xff] %v1815_v62 }
 0x1e8   : > { %v1733_v58 = vpop.permute.xlu1 %1732  ;;  %v1768_v7 = vpop.permute.xlu0 %1767 }
 0x1e9   : > { %v1810_v0 = vmul.f32 %v3817_v63, %v1733_v58  ;;  %v1817_v8 = vmul.f32 %v3853_v4, %v1768_v7 }
 0x1eb   : > { %1842 = vst [vmem:[%s3733_s29 + $0xa0] sm:$0xff] %v1810_v0  ;;  %1849 = vst [vmem:[%s3733_s29 + $0xd8] sm:$0xff] %v1817_v8 }
 0x1ec   : > { %v1743_v11 = vpop.permute.xlu1 %1742 }
 0x1ed   : > { %v1812_v50 = vmul.f32 %v3831_v25, %v1743_v11  ;;  %v1778_v2 = vpop.permute.xlu0 %1777 }
 0x1ee   : > { %v1819_v19 = vmul.f32 %v3857_v10, %v1778_v2 }
 0x1ef   : > { %1844 = vst [vmem:[%s3733_s29 + $0xb0] sm:$0xff] %v1812_v50 }
 0x1f0   : > { %v1753_v20 = vpop.permute.xlu1 %1752  ;;  %1851 = vst [vmem:[%s3733_s29 + $0xe8] sm:$0xff] %v1819_v19 }
 0x1f1   : > { %v1814_v28 = vmul.f32 %v3865_v27, %v1753_v20  ;;  %v1788_v32 = vpop.permute.xlu0 %1787 }
 0x1f2   : > { %v1821_v34 = vmul.f32 %v3872_v33, %v1788_v32 }
 0x1f3   : > { %1846 = vst [vmem:[%s3733_s29 + $0xc0] sm:$0xff] %v1814_v28 }
 0x1f4   : > { %v1763_v16 = vpop.permute.xlu1 %1762  ;;  %1853 = vst [vmem:[%s3733_s29 + $0xf8] sm:$0xff] %v1821_v34 }
 0x1f5   : > { %v1816_v39 = vmul.f32 %v3876_v17, %v1763_v16 }
 0x1f7   : > { %1848 = vst [vmem:[%s3733_s29 + $0xd0] sm:$0xff] %v1816_v39 }
 0x1f8   : > { %v1773_v13 = vpop.permute.xlu1 %1772 }
 0x1f9   : > { %v1818_v1 = vmul.f32 %v3882_v12, %v1773_v13 }
 0x1fb   : > { %1850 = vst [vmem:[%s3733_s29 + $0xe0] sm:$0xff] %v1818_v1 }
 0x1fc   : > { %v1783_v22 = vpop.permute.xlu1 %1782 }
 0x1fd   : > { %v1820_v29 = vmul.f32 %v3887_v23, %v1783_v22 }
 0x1ff   : > { %1852 = vst [vmem:[%s3733_s29 + $0xf0] sm:$0xff] %v1820_v29 }
 0x200   : > { %2962 = shalt.err (!%p2959_p13)
}
 0x201   : > { %s2963_s30 = scalar_lea.hbm %s3899_s27, 4096  ;;  %s2967_s19 = scalar_lea.hbm %s4134_s9, 8192 }
 0x202   : > { %p2964_p6 = scmp.ne.s32.totalorder %s3899_s27, %s2963_s30  ;;  %p2968_p5 = scmp.lt.u32.totalorder %s3899_s27, %s4134_s9 }
 0x203   : > { %p2969_p8 = scmp.lt.u32.totalorder %s2967_s19, %s2963_s30  ;;  %p2971_p0 = scmp.lt.u32.totalorder %s2963_s30, %s3899_s27 }
 0x204   : > { %p2965_p10 = pnand %p2964_p6, %p4160_p2 }
 0x205   : > { %p2970_p11 = por %p2969_p8, %p2968_p5 }
 0x206   : > { %p2966_p4 = pneg %p2965_p10 }
 0x207   : > { %p2972_p3 = por %p2971_p0, %p2970_p11 }
 0x209   : > { %p2973_p7 = pnand %p2972_p3, %p2966_p4 }
 0x20b   : > { %2976 = shalt.err (!%p2973_p7)
}
 0x20c   : > { %s3088_s0 = smov 128   ;;  %s3089_s28 = smov 8  }
 0x20d   : > { %2502 = dma.vmem_to_hbm [thread:$0]  (%p4160_p2), %s3902_s24, 4096, %s3899_s27, %s3904_s14, %s3088_s0, %s3088_s0, %s3089_s28  }
 0x20e   : > { %s3935_s30 = scalar_lea.hbm %s4135_s10, %s3893_s20  ;;  %s1910_s19 = sshll.u32 %s3733_s29, 4  ;;  %s3938_s19 = int_to_ptr.vmem [resolvable:$true] %s1910_s19 }
 0x20f   : > { %s2977_s7 = scalar_lea.vmem %s3938_s19, 4096  ;;  %s3090_s23 = smov [#allocation12]  }
 0x210   : > { %p2978_p9 = scmp.ne.s32.totalorder %s3938_s19, %s2977_s7  ;;  %s2981_s1 = sshll.u32 %s3090_s23, 4  ;;  %s2982_s1 = int_to_ptr.vmem [resolvable:$false] %s2981_s1 }
 0x211   : > { %s2983_s27 = scalar_lea.vmem %s2982_s1, 8192  ;;  %p2984_p13 = scmp.lt.s32.totalorder %s3938_s19, %s2982_s1 }
 0x212   : > { %p2979_p12 = pnand %p2978_p9, %p4160_p2  ;;  %p2985_p6 = scmp.lt.s32.totalorder %s2983_s27, %s2977_s7 }
 0x214   : > { %p2980_p1 = pneg %p2979_p12  ;;  %p2986_p10 = por %p2985_p6, %p2984_p13 }
 0x216   : > { %p2987_p4 = pnand %p2986_p10, %p2980_p1 }
 0x218   : > { %2990 = shalt.err (!%p2987_p4)
}
 0x219   : > { %s2991_s29 = scalar_lea.hbm %s3935_s30, 4096  ;;  %s2995_s26 = scalar_lea.hbm %s4135_s10, 8192 }
 0x21a   : > { %p2992_p5 = scmp.ne.s32.totalorder %s3935_s30, %s2991_s29  ;;  %p2996_p0 = scmp.lt.u32.totalorder %s3935_s30, %s4135_s10 }
 0x21b   : > { %p2997_p3 = scmp.lt.u32.totalorder %s2995_s26, %s2991_s29  ;;  %p2999_p9 = scmp.lt.u32.totalorder %s2991_s29, %s3935_s30 }
 0x21c   : > { %p2993_p8 = pnand %p2992_p5, %p4160_p2 }
 0x21d   : > { %p2998_p7 = por %p2997_p3, %p2996_p0 }
 0x21e   : > { %p2994_p11 = pneg %p2993_p8 }
 0x21f   : > { %p3000_p12 = por %p2999_p9, %p2998_p7 }
 0x221   : > { %p3001_p1 = pnand %p3000_p12, %p2994_p11 }
 0x223   : > { %3004 = shalt.err (!%p3001_p1)
}
 0x224   : > { %2503 = dma.vmem_to_hbm [thread:$0]  (%p4160_p2), %s3938_s19, 4096, %s3935_s30, %s3904_s14, %s3088_s0, %s3088_s0, %s3089_s28  }
 0x225   : > { %v3968_v30 = vld [vmem:[%s4130_s5] ss:$0 sm:$0xff]  ;;  %s3989_s14 = scalar_lea.vmem [#allocation9], %s3336_s13  ;;  %s4073_s29 = scalar_lea.hbm %s4133_s8, %s3893_s20 }
 0x226   : > { %s1878_s13 = sshll.u32 %s3989_s14, 4  ;;  %s1855_s24 = scalar_lea.sflag [#allocation5], %s3333_s21  ;;  %s4075_s13 = int_to_ptr.vmem [resolvable:$true] %s1878_s13 }
 0x227   : > { %s3005_s22 = scalar_lea.vmem %s4075_s13, 4096  ;;  %s3091_s26 = smov [#allocation9]  }
 0x228   : > { %p3006_p13 = scmp.ne.s32.totalorder %s4075_s13, %s3005_s22  ;;  %s3009_s23 = sshll.u32 %s3091_s26, 4  ;;  %s3010_s23 = int_to_ptr.vmem [resolvable:$false] %s3009_s23 }
 0x229   : > { %s3011_s1 = scalar_lea.vmem %s3010_s23, 8192  ;;  %p3012_p4 = scmp.lt.s32.totalorder %s4075_s13, %s3010_s23 }
 0x22a   : > { %p3007_p6 = pnand %p3006_p13, %p4160_p2  ;;  %p3013_p5 = scmp.lt.s32.totalorder %s3011_s1, %s3005_s22 }
 0x22c   : > { %p3008_p10 = pneg %p3007_p6  ;;  %p3014_p8 = por %p3013_p5, %p3012_p4 }
 0x22e   : > { %p3015_p11 = pnand %p3014_p8, %p3008_p10 }
 0x240   : > { %v2381_v36 = vpop.f32.mrb[0].mxu1 }
 0x241   : > { %v816_v38 = vadd.f32 %v2381_v36, %v3968_v30  ;;  %v810_v42 = vpop.f32.mrb[1].mxu1 }
 0x242   : > { %v811_v43 = vadd.f32 %v3968_v30, %v810_v42 }
 0x243   : > { %v2090_v48 = vmul.f32 -1.442695, %v816_v38 }
 0x244   : > { %v2089_v56 = vmul.f32 -1.442695, %v811_v43  ;;  %v2384_v57 = vpop.f32.mrb[2].mxu1 }
 0x245   : > { %2703 = vpow2.f32 %v2090_v48  ;;  %v826_v58 = vadd.f32 %v2384_v57, %v3968_v30  ;;  %v820_v0 = vpop.f32.mrb[3].mxu1 }
 0x246   : > { %2705 = vpow2.f32 %v2089_v56  ;;  %v821_v6 = vadd.f32 %v3968_v30, %v820_v0 }
 0x247   : > { %v2092_v7 = vmul.f32 -1.442695, %v826_v58 }
 0x248   : > { %v2091_v11 = vmul.f32 -1.442695, %v821_v6  ;;  %v2387_v26 = vpop.f32.mrb[4].mxu1 }
 0x249   : > { %2707 = vpow2.f32 %v2092_v7  ;;  %v836_v50 = vadd.f32 %v2387_v26, %v3968_v30  ;;  %v830_v47 = vpop.f32.mrb[5].mxu1 }
 0x24a   : > { %2709 = vpow2.f32 %v2091_v11  ;;  %v831_v53 = vadd.f32 %v3968_v30, %v830_v47 }
 0x24b   : > { %v2094_v59 = vmul.f32 -1.442695, %v836_v50 }
 0x24c   : > { %v2093_v62 = vmul.f32 -1.442695, %v831_v53  ;;  %v2390_v2 = vpop.f32.mrb[6].mxu1 }
 0x24d   : > { %2711 = vpow2.f32 %v2094_v59  ;;  %v846_v8 = vadd.f32 %v2390_v2, %v3968_v30  ;;  %v840_v19 = vpop.f32.mrb[7].mxu1 }
 0x24e   : > { %2713 = vpow2.f32 %v2093_v62  ;;  %v841_v20 = vadd.f32 %v3968_v30, %v840_v19 }
 0x24f   : > { %v2704_v28 = vpop.eup %2703  ;;  %v2096_v32 = vmul.f32 -1.442695, %v846_v8 }
 0x250   : > { %v2706_v34 = vpop.eup %2705  ;;  %v1066_v16 = vadd.f32 1.0, %v2704_v28  ;;  %v2095_v39 = vmul.f32 -1.442695, %v841_v20  ;;  %v2393_v13 = vpop.f32.mrb[8].mxu1 }
 0x251   : > { %v1065_v1 = vadd.f32 1.0, %v2706_v34  ;;  %2715 = vpow2.f32 %v2096_v32  ;;  %v856_v22 = vadd.f32 %v2393_v13, %v3968_v30  ;;  %v850_v29 = vpop.f32.mrb[9].mxu1 }
 0x252   : > { %2717 = vrcp.f32 %v1066_v16  ;;  %v851_v36 = vadd.f32 %v3968_v30, %v850_v29 }
 0x253   : > { %v2708_v38 = vpop.eup %2707  ;;  %2719 = vrcp.f32 %v1065_v1  ;;  %v2098_v42 = vmul.f32 -1.442695, %v856_v22 }
 0x254   : > { %v2710_v43 = vpop.eup %2709  ;;  %v1068_v48 = vadd.f32 1.0, %v2708_v38  ;;  %2721 = vpow2.f32 %v2095_v39  ;;  %v2097_v56 = vmul.f32 -1.442695, %v851_v36  ;;  %v2396_v57 = vpop.f32.mrb[10].mxu1 }
 0x255   : > { %v1067_v58 = vadd.f32 1.0, %v2710_v43  ;;  %2723 = vpow2.f32 %v2098_v42  ;;  %v866_v0 = vadd.f32 %v2396_v57, %v3968_v30  ;;  %v860_v6 = vpop.f32.mrb[11].mxu1 }
 0x256   : > { %2725 = vrcp.f32 %v1068_v48  ;;  %v861_v7 = vadd.f32 %v3968_v30, %v860_v6 }
 0x257   : > { %v2712_v11 = vpop.eup %2711  ;;  %2727 = vrcp.f32 %v1067_v58  ;;  %v2100_v26 = vmul.f32 -1.442695, %v866_v0 }
 0x258   : > { %v2714_v50 = vpop.eup %2713  ;;  %v1070_v47 = vadd.f32 1.0, %v2712_v11  ;;  %2729 = vpow2.f32 %v2097_v56  ;;  %v2099_v53 = vmul.f32 -1.442695, %v861_v7  ;;  %v2399_v59 = vpop.f32.mrb[12].mxu1 }
 0x259   : > { %v1069_v62 = vadd.f32 1.0, %v2714_v50  ;;  %2731 = vpow2.f32 %v2100_v26  ;;  %v876_v2 = vadd.f32 %v2399_v59, %v3968_v30  ;;  %v870_v8 = vpop.f32.mrb[13].mxu1 }
 0x25a   : > { %2733 = vrcp.f32 %v1070_v47  ;;  %v871_v19 = vadd.f32 %v3968_v30, %v870_v8 }
 0x25b   : > { %v2716_v20 = vpop.eup %2715  ;;  %2735 = vrcp.f32 %v1069_v62  ;;  %v2102_v28 = vmul.f32 -1.442695, %v876_v2 }
 0x25c   : > { %v2718_v32 = vpop.eup %2717  ;;  %v1072_v34 = vadd.f32 1.0, %v2716_v20  ;;  %2737 = vpow2.f32 %v2099_v53  ;;  %v2101_v16 = vmul.f32 -1.442695, %v871_v19  ;;  %v2402_v39 = vpop.f32.mrb[14].mxu1 }
 0x25d   : > { %v2720_v13 = vpop.eup %2719  ;;  %v1162_v1 = vmul.f32 %v3737_v41, %v2718_v32  ;;  %2739 = vpow2.f32 %v2102_v28  ;;  %v886_v22 = vadd.f32 %v2402_v39, %v3968_v30  ;;  %v880_v29 = vpop.f32.mrb[15].mxu1 }
 0x25e   : > { %v2722_v36 = vpop.eup %2721  ;;  %v1161_v38 = vmul.f32 %v3729_v18, %v2720_v13  ;;  %2741 = vrcp.f32 %v1072_v34  ;;  %v881_v42 = vadd.f32 %v3968_v30, %v880_v29 }
 0x25f   : > { %v2724_v43 = vpop.eup %2723  ;;  %1194 = vst [vmem:[%s3989_s14 + $0x8] sm:$0xff] %v1162_v1  ;;  %v1071_v48 = vadd.f32 1.0, %v2722_v36  ;;  %2743 = vpow2.f32 %v2101_v16  ;;  %v2104_v56 = vmul.f32 -1.442695, %v886_v22 }
 0x260   : > { %v2726_v41 = vpop.eup %2725  ;;  %1193 = vst [vmem:[%s3989_s14] sm:$0xff] %v1161_v38  ;;  %v1074_v57 = vadd.f32 1.0, %v2724_v43  ;;  %v2103_v58 = vmul.f32 -1.442695, %v881_v42  ;;  %v2405_v0 = vpop.f32.mrb[16].mxu1 }
 0x261   : > { %v2728_v18 = vpop.eup %2727  ;;  %v1164_v6 = vmul.f32 %v3747_v52, %v2726_v41  ;;  %2745 = vrcp.f32 %v1071_v48  ;;  %v896_v7 = vadd.f32 %v2405_v0, %v3968_v30  ;;  %v890_v11 = vpop.f32.mrb[17].mxu1 }
 0x262   : > { %v2730_v26 = vpop.eup %2729  ;;  %v1163_v50 = vmul.f32 %v3742_v46, %v2728_v18  ;;  %2747 = vrcp.f32 %v1074_v57  ;;  %v891_v47 = vadd.f32 %v3968_v30, %v890_v11 }
 0x263   : > { %v2732_v53 = vpop.eup %2731  ;;  %1196 = vst [vmem:[%s3989_s14 + $0x18] sm:$0xff] %v1164_v6  ;;  %v1073_v59 = vadd.f32 1.0, %v2730_v26  ;;  %2749 = vpow2.f32 %v2104_v56  ;;  %v2106_v62 = vmul.f32 -1.442695, %v896_v7 }
 0x264   : > { %v2734_v2 = vpop.eup %2733  ;;  %1195 = vst [vmem:[%s3989_s14 + $0x10] sm:$0xff] %v1163_v50  ;;  %v1076_v8 = vadd.f32 1.0, %v2732_v53  ;;  %2751 = vpow2.f32 %v2103_v58  ;;  %v2105_v52 = vmul.f32 -1.442695, %v891_v47  ;;  %v2408_v19 = vpop.f32.mrb[18].mxu1 }
 0x265   : > { %v2736_v20 = vpop.eup %2735  ;;  %v1166_v28 = vmul.f32 %v3757_v61, %v2734_v2  ;;  %2753 = vrcp.f32 %v1073_v59  ;;  %v906_v46 = vadd.f32 %v2408_v19, %v3968_v30  ;;  %v900_v32 = vpop.f32.mrb[19].mxu1 }
 0x266   : > { %v2738_v34 = vpop.eup %2737  ;;  %v1165_v16 = vmul.f32 %v3752_v55, %v2736_v20  ;;  %2755 = vrcp.f32 %v1076_v8  ;;  %v901_v39 = vadd.f32 %v3968_v30, %v900_v32 }
 0x267   : > { %v2740_v13 = vpop.eup %2739  ;;  %1198 = vst [vmem:[%s3989_s14 + $0x28] sm:$0xff] %v1166_v28  ;;  %v1075_v1 = vadd.f32 1.0, %v2738_v34  ;;  %2757 = vpow2.f32 %v2106_v62  ;;  %v2108_v22 = vmul.f32 -1.442695, %v906_v46 }
 0x268   : > { %v2742_v29 = vpop.eup %2741  ;;  %1197 = vst [vmem:[%s3989_s14 + $0x20] sm:$0xff] %v1165_v16  ;;  %v1078_v36 = vadd.f32 1.0, %v2740_v13  ;;  %2759 = vpow2.f32 %v2105_v52  ;;  %v2411_v61 = vpop.f32.mrb[20].mxu1  ;;  %v2107_v43 = vmul.f32 -1.442695, %v901_v39 }
 0x269   : > { %v2744_v38 = vpop.eup %2743  ;;  %v1168_v42 = vmul.f32 %v3772_v24, %v2742_v29  ;;  %2761 = vrcp.f32 %v1075_v1  ;;  %v916_v55 = vadd.f32 %v2411_v61, %v3968_v30  ;;  %v910_v48 = vpop.f32.mrb[21].mxu1 }
 0x26a   : > { %2763 = vrcp.f32 %v1078_v36  ;;  %v1077_v56 = vadd.f32 1.0, %v2744_v38  ;;  %v911_v41 = vadd.f32 %v3968_v30, %v910_v48 }
 0x26b   : > { %v2746_v57 = vpop.eup %2745  ;;  %1200 = vst [vmem:[%s3989_s14 + $0x38] sm:$0xff] %v1168_v42  ;;  %2765 = vpow2.f32 %v2108_v22  ;;  %v2110_v58 = vmul.f32 -1.442695, %v916_v55 }
 0x26c   : > { %v2748_v0 = vpop.eup %2747  ;;  %v1167_v18 = vmul.f32 %v3767_v9, %v2746_v57  ;;  %2767 = vrcp.f32 %v1077_v56  ;;  %v2109_v24 = vmul.f32 -1.442695, %v911_v41  ;;  %v2414_v6 = vpop.f32.mrb[22].mxu1 }
 0x26d   : > { %v2750_v7 = vpop.eup %2749  ;;  %v1170_v11 = vmul.f32 %v3761_v3, %v2748_v0  ;;  %2769 = vpow2.f32 %v2107_v43  ;;  %v926_v26 = vadd.f32 %v2414_v6, %v3968_v30  ;;  %v920_v50 = vpop.f32.mrb[23].mxu1 }
 0x26e   : > { %v2752_v47 = vpop.eup %2751  ;;  %1199 = vst [vmem:[%s3989_s14 + $0x30] sm:$0xff] %v1167_v18  ;;  %v1080_v53 = vadd.f32 1.0, %v2750_v7  ;;  %2771 = vpow2.f32 %v2110_v58  ;;  %v921_v59 = vadd.f32 %v3968_v30, %v920_v50 }
 0x26f   : > { %v2754_v62 = vpop.eup %2753  ;;  %1202 = vst [vmem:[%s3989_s14 + $0x48] sm:$0xff] %v1170_v11  ;;  %v1079_v9 = vadd.f32 1.0, %v2752_v47  ;;  %2773 = vpow2.f32 %v2109_v24  ;;  %v2112_v2 = vmul.f32 -1.442695, %v926_v26 }
 0x270   : > { %v2756_v8 = vpop.eup %2755  ;;  %v1169_v3 = vmul.f32 %v3777_v15, %v2754_v62  ;;  %2775 = vrcp.f32 %v1080_v53  ;;  %v2111_v52 = vmul.f32 -1.442695, %v921_v59  ;;  %v2417_v19 = vpop.f32.mrb[24].mxu1 }
 0x271   : > { %v2758_v20 = vpop.eup %2757  ;;  %v1172_v28 = vmul.f32 %v3801_v37, %v2756_v8  ;;  %2777 = vrcp.f32 %v1079_v9  ;;  %v936_v46 = vadd.f32 %v2417_v19, %v3968_v30  ;;  %v930_v32 = vpop.f32.mrb[25].mxu1 }
 0x272   : > { %v2760_v34 = vpop.eup %2759  ;;  %1201 = vst [vmem:[%s3989_s14 + $0x40] sm:$0xff] %v1169_v3  ;;  %v1082_v16 = vadd.f32 1.0, %v2758_v20  ;;  %2779 = vpow2.f32 %v2112_v2  ;;  %v931_v39 = vadd.f32 %v3968_v30, %v930_v32 }
 0x273   : > { %v2762_v13 = vpop.eup %2761  ;;  %1204 = vst [vmem:[%s3989_s14 + $0x58] sm:$0xff] %v1172_v28  ;;  %v1081_v15 = vadd.f32 1.0, %v2760_v34  ;;  %2781 = vpow2.f32 %v2111_v52  ;;  %v2114_v1 = vmul.f32 -1.442695, %v936_v46 }
 0x274   : > { %v2764_v22 = vpop.eup %2763  ;;  %v1171_v37 = vmul.f32 %v3782_v35, %v2762_v13  ;;  %2783 = vrcp.f32 %v1082_v16  ;;  %v2113_v29 = vmul.f32 -1.442695, %v931_v39  ;;  %v2420_v36 = vpop.f32.mrb[26].mxu1 }
 0x275   : > { %v2766_v61 = vpop.eup %2765  ;;  %v1174_v38 = vmul.f32 %v3811_v49, %v2764_v22  ;;  %2785 = vrcp.f32 %v1081_v15  ;;  %v946_v42 = vadd.f32 %v2420_v36, %v3968_v30  ;;  %v940_v43 = vpop.f32.mrb[27].mxu1 }
 0x276   : > { %v2768_v55 = vpop.eup %2767  ;;  %1203 = vst [vmem:[%s3989_s14 + $0x50] sm:$0xff] %v1171_v37  ;;  %v1084_v48 = vadd.f32 1.0, %v2766_v61  ;;  %2787 = vpow2.f32 %v2114_v1  ;;  %v941_v56 = vadd.f32 %v3968_v30, %v940_v43 }
 0x277   : > { %v2770_v41 = vpop.eup %2769  ;;  %1206 = vst [vmem:[%s3989_s14 + $0x68] sm:$0xff] %v1174_v38  ;;  %v1173_v35 = vmul.f32 %v3787_v21, %v2768_v55  ;;  %2789 = vpow2.f32 %v2113_v29  ;;  %v2116_v57 = vmul.f32 -1.442695, %v946_v42 }
 0x278   : > { %v2772_v58 = vpop.eup %2771  ;;  %2791 = vrcp.f32 %v1084_v48  ;;  %v1083_v49 = vadd.f32 1.0, %v2770_v41  ;;  %v2423_v0 = vpop.f32.mrb[28].mxu1  ;;  %v2115_v6 = vmul.f32 -1.442695, %v941_v56 }
 0x279   : > { %v2774_v18 = vpop.eup %2773  ;;  %1205 = vst [vmem:[%s3989_s14 + $0x60] sm:$0xff] %v1173_v35  ;;  %v1086_v24 = vadd.f32 1.0, %v2772_v58  ;;  %2793 = vpow2.f32 %v2116_v57  ;;  %v956_v7 = vadd.f32 %v2423_v0, %v3968_v30  ;;  %v950_v11 = vpop.f32.mrb[29].mxu1 }
 0x27a   : > { %v2776_v26 = vpop.eup %2775  ;;  %2795 = vrcp.f32 %v1083_v49  ;;  %v1085_v50 = vadd.f32 1.0, %v2774_v18  ;;  %v951_v21 = vadd.f32 %v3968_v30, %v950_v11 }
 0x27b   : > { %v2778_v47 = vpop.eup %2777  ;;  %v1176_v53 = vmul.f32 %v3821_v5, %v2776_v26  ;;  %2797 = vrcp.f32 %v1086_v24  ;;  %v2118_v59 = vmul.f32 -1.442695, %v956_v7 }
 0x27c   : > { %v2780_v62 = vpop.eup %2779  ;;  %v1175_v9 = vmul.f32 %v3792_v40, %v2778_v47  ;;  %2799 = vrcp.f32 %v1085_v50  ;;  %v2426_v2 = vpop.f32.mrb[30].mxu1  ;;  %v2117_v52 = vmul.f32 -1.442695, %v951_v21 }
 0x27d   : > { %v2782_v8 = vpop.eup %2781  ;;  %1208 = vst [vmem:[%s3989_s14 + $0x78] sm:$0xff] %v1176_v53  ;;  %v1088_v3 = vadd.f32 1.0, %v2780_v62  ;;  %2801 = vpow2.f32 %v2115_v6  ;;  %v966_v19 = vadd.f32 %v2426_v2, %v3968_v30  ;;  %v960_v20 = vpop.f32.mrb[31].mxu1 }
 0x27e   : > { %v2784_v28 = vpop.eup %2783  ;;  %1207 = vst [vmem:[%s3989_s14 + $0x70] sm:$0xff] %v1175_v9  ;;  %v1087_v46 = vadd.f32 1.0, %v2782_v8  ;;  %2803 = vpow2.f32 %v2118_v59  ;;  %v961_v5 = vadd.f32 %v3968_v30, %v960_v20 }
 0x27f   : > { %v2786_v32 = vpop.eup %2785  ;;  %v1178_v40 = vmul.f32 %v3827_v14, %v2784_v28  ;;  %2805 = vrcp.f32 %v1088_v3  ;;  %v2120_v34 = vmul.f32 -1.442695, %v966_v19 }
 0x280   : > { %v2788_v16 = vpop.eup %2787  ;;  %v1177_v39 = vmul.f32 %v3797_v31, %v2786_v32  ;;  %2807 = vrcp.f32 %v1087_v46  ;;  %v2119_v1 = vmul.f32 -1.442695, %v961_v5 }
 0x281   : > { %v2790_v13 = vpop.eup %2789  ;;  %1210 = vst [vmem:[%s3989_s14 + $0x88] sm:$0xff] %v1178_v40  ;;  %v1090_v15 = vadd.f32 1.0, %v2788_v16  ;;  %2809 = vpow2.f32 %v2117_v52 }
 0x282   : > { %v2792_v22 = vpop.eup %2791  ;;  %1209 = vst [vmem:[%s3989_s14 + $0x80] sm:$0xff] %v1177_v39  ;;  %v1089_v37 = vadd.f32 1.0, %v2790_v13  ;;  %2811 = vpow2.f32 %v2120_v34 }
 0x283   : > { %v2794_v30 = vpop.eup %2793  ;;  %v1180_v14 = vmul.f32 %v3836_v45, %v2792_v22  ;;  %2813 = vrcp.f32 %v1090_v15 }
 0x284   : > { %v2796_v29 = vpop.eup %2795  ;;  %2815 = vrcp.f32 %v1089_v37  ;;  %v1092_v31 = vadd.f32 1.0, %v2794_v30 }
 0x285   : > { %v2798_v36 = vpop.eup %2797  ;;  %1212 = vst [vmem:[%s3989_s14 + $0x98] sm:$0xff] %v1180_v14  ;;  %v1179_v61 = vmul.f32 %v3807_v44, %v2796_v29  ;;  %2817 = vpow2.f32 %v2119_v1 }
 0x286   : > { %v2800_v38 = vpop.eup %2799  ;;  %v1182_v42 = vmul.f32 %v3840_v51, %v2798_v36  ;;  %2819 = vrcp.f32 %v1092_v31 }
 0x287   : > { %v2802_v43 = vpop.eup %2801  ;;  %1211 = vst [vmem:[%s3989_s14 + $0x90] sm:$0xff] %v1179_v61  ;;  %v1181_v45 = vmul.f32 %v3817_v63, %v2800_v38 }
 0x288   : > { %v2804_v55 = vpop.eup %2803  ;;  %1214 = vst [vmem:[%s3989_s14 + $0xa8] sm:$0xff] %v1182_v42  ;;  %v1091_v48 = vadd.f32 1.0, %v2802_v43 }
 0x289   : > { %v2806_v56 = vpop.eup %2805  ;;  %1213 = vst [vmem:[%s3989_s14 + $0xa0] sm:$0xff] %v1181_v45  ;;  %v1094_v41 = vadd.f32 1.0, %v2804_v55 }
 0x28a   : > { %v2808_v35 = vpop.eup %2807  ;;  %v1184_v44 = vmul.f32 %v3844_v54, %v2806_v56  ;;  %2821 = vrcp.f32 %v1091_v48 }
 0x28b   : > { %v2810_v57 = vpop.eup %2809  ;;  %v1183_v51 = vmul.f32 %v3831_v25, %v2808_v35  ;;  %2823 = vrcp.f32 %v1094_v41 }
 0x28c   : > { %v2812_v58 = vpop.eup %2811  ;;  %1216 = vst [vmem:[%s3989_s14 + $0xb8] sm:$0xff] %v1184_v44  ;;  %v1093_v63 = vadd.f32 1.0, %v2810_v57 }
 0x28d   : > { %v2814_v49 = vpop.eup %2813  ;;  %1215 = vst [vmem:[%s3989_s14 + $0xb0] sm:$0xff] %v1183_v51  ;;  %v1096_v0 = vadd.f32 1.0, %v2812_v58 }
 0x28e   : > { %v2816_v18 = vpop.eup %2815  ;;  %v1186_v24 = vmul.f32 %v3848_v60, %v2814_v49  ;;  %2825 = vrcp.f32 %v1093_v63 }
 0x28f   : > { %v2818_v54 = vpop.eup %2817  ;;  %v1185_v6 = vmul.f32 %v3865_v27, %v2816_v18  ;;  %2827 = vrcp.f32 %v1096_v0 }
 0x290   : > { %v2820_v25 = vpop.eup %2819  ;;  %1218 = vst [vmem:[%s3989_s14 + $0xc8] sm:$0xff] %v1186_v24  ;;  %v1095_v7 = vadd.f32 1.0, %v2818_v54 }
 0x291   : > { %1217 = vst [vmem:[%s3989_s14 + $0xc0] sm:$0xff] %v1185_v6  ;;  %v1188_v11 = vmul.f32 %v3853_v4, %v2820_v25 }
 0x292   : > { %2829 = vrcp.f32 %v1095_v7 }
 0x293   : > { %1220 = vst [vmem:[%s3989_s14 + $0xd8] sm:$0xff] %v1188_v11 }
 0x294   : > { %v2822_v60 = vpop.eup %2821 }
 0x295   : > { %v2824_v26 = vpop.eup %2823  ;;  %v1187_v50 = vmul.f32 %v3876_v17, %v2822_v60 }
 0x296   : > { %v1190_v27 = vmul.f32 %v3857_v10, %v2824_v26 }
 0x297   : > { %1219 = vst [vmem:[%s3989_s14 + $0xd0] sm:$0xff] %v1187_v50 }
 0x298   : > { %v2826_v21 = vpop.eup %2825  ;;  %1222 = vst [vmem:[%s3989_s14 + $0xe8] sm:$0xff] %v1190_v27 }
 0x299   : > { %v2828_v47 = vpop.eup %2827  ;;  %v1189_v53 = vmul.f32 %v3882_v12, %v2826_v21 }
 0x29a   : > { %v1192_v4 = vmul.f32 %v3872_v33, %v2828_v47 }
 0x29b   : > { %1221 = vst [vmem:[%s3989_s14 + $0xe0] sm:$0xff] %v1189_v53 }
 0x29c   : > { %v2830_v59 = vpop.eup %2829  ;;  %1224 = vst [vmem:[%s3989_s14 + $0xf8] sm:$0xff] %v1192_v4 }
 0x29d   : > { %v1191_v62 = vmul.f32 %v3887_v23, %v2830_v59 }
 0x29f   : > { %1223 = vst [vmem:[%s3989_s14 + $0xf0] sm:$0xff] %v1191_v62 }
 0x2a0   : > { %3018 = shalt.err (!%p3015_p11)
}
 0x2a1   : > { %s3019_s20 = scalar_lea.hbm %s4073_s29, 4096  ;;  %s3023_s14 = scalar_lea.hbm %s4133_s8, 8192 }
 0x2a2   : > { %p3020_p0 = scmp.ne.s32.totalorder %s4073_s29, %s3019_s20  ;;  %p3024_p9 = scmp.lt.u32.totalorder %s4073_s29, %s4133_s8 }
 0x2a3   : > { %p3025_p12 = scmp.lt.u32.totalorder %s3023_s14, %s3019_s20  ;;  %p3027_p13 = scmp.lt.u32.totalorder %s3019_s20, %s4073_s29 }
 0x2a4   : > { %p3021_p3 = pnand %p3020_p0, %p4160_p2 }
 0x2a5   : > { %p3026_p1 = por %p3025_p12, %p3024_p9 }
 0x2a6   : > { %p3022_p7 = pneg %p3021_p3 }
 0x2a7   : > { %p3028_p6 = por %p3027_p13, %p3026_p1 }
 0x2a9   : > { %p3029_p10 = pnand %p3028_p6, %p3022_p7 }
 0x2ab   : > { %3032 = shalt.err (!%p3029_p10)
}
 0x2ac   : > { %2501 = dma.vmem_to_hbm [thread:$0]  (%p4160_p2), %s4075_s13, 4096, %s4073_s29, %s1855_s24, %s3088_s0, %s3088_s0, %s3089_s28  }
 0x2ad PF: > { %s4161_s22 = sld [smem:[#allocation17_spill]]  ;;  %s1925_s26 = sand.u32 1, %s3067_s15  }
 0x2ae   : > { %p4163_p5 = scmp.ge.s32.totalorder %s3079_s18, 2  ;;  %s1926_s23 = scalar_lea.sflag [#allocation5], %s1925_s26 }
 0x2b3   : > { %p4162_p4 = scmp.ne.s32.totalorder %s4161_s22, 0 }
 0x2b5   : > { %p2519_p8 = pnand %p4163_p5, %p4162_p4 }
 0x2b7   : > { %3058 = dma.done.wait (!%p2519_p8), %s1926_s23, 4096  }
 0x2b8   : > { %3060 = vsyncadd (!%p2519_p8), %s1926_s23, 4294963200  ;;  %s4164_s11 = sadd.s32 4294967294, %s3079_s18  }
 0x2b9   : > { %s1934_s1 = sand.u32 1, %s4164_s11  }
 0x2ba   : > { %s1935_s20 = scalar_lea.sflag [#allocation11], %s1934_s1 }
 0x2bb   : > { %3062 = dma.done.wait (!%p2519_p8), %s1935_s20, 8192  }
 0x2bc   : > { %3064 = vsyncadd (!%p2519_p8), %s1935_s20, 4294959104  ;;  %p30_p2 = scmp.ge.s32.totalorder %s3268_s25, 4   ;;  %s4165_s15 = smov %s3071_s16 }
 0x2bd   : > { %s4166_s16 = smov %s3075_s17  ;;  %s4167_s17 = smov %s3284_s12 }
 0x2be   : > { %s4168_s18 = smov %s3268_s25  ;;  %32 = sbr.rel (!%p30_p2) target bundleno = 11 (0xb), region = 140 }
 0x2c5   :  { %1949 = vsyncpa [#allocation4], 1 }
 0x2c6   :  { %1951 = vsyncpa [#allocation4 + $0x1], 1 }
 0x2c7   :  { %1952 = vsyncpa [#allocation7], 1 }
 0x2c8   :  { %1953 = vsyncpa [#allocation5], 1 }
 0x2c9   :  { %1955 = vsyncpa [#allocation5 + $0x1], 1 }
 0x2ca   :  { %1956 = vsyncpa [#allocation11], 1 }
 0x2cb   :  { %1958 = vsyncpa [#allocation11 + $0x1], 1 }

</bundles_post_ra>
